<compile_context>
chip_gen: v7x
topology: tpu7x:2x2x1
jax: 0.10.0
libtpu: 0.0.40
codegen_flags: <defaults>
</compile_context>

<pallas_src>
import functools

import jax
import jax.numpy as jnp
from jax import lax
from jax.experimental import pallas as pl
from jax.experimental.pallas import tpu as pltpu

_CLAMP = 1e-6      # clamp for arccosh argument (f32-safe)
_MIN_SQ = 1e-7     # clamp for y0^2 - 1 under the sqrt
_MIN_NORM = 1e-8   # clamp for tangent-vector norm in expmap0
_LN_EPS = 1e-5     # nn.LayerNorm default eps


def _round_up(v, m):
    return (v + m - 1) // m * m


def _vmem_budget():
    """~3/4 of physical VMEM, capped at 100 MiB (v7x: ~48 MiB, v5e/v6e: ~96 MiB)."""
    cap = 64 * 1024 * 1024            # conservative default: v7x per-TC VMEM
    try:
        info = pltpu.get_tpu_info()
        v = getattr(info, "vmem_capacity_bytes", None)
        if v:
            cap = int(v)
    except Exception:
        pass
    return int(min(100 * 1024 * 1024, (cap * 3) // 4))


# --------------------------- in-kernel Lorentz (k=1) helpers ---------------------------
def _fast_recip(x):
    # EUP approximate reciprocal + one Newton step (~f32 accuracy, off the VALU divide).
    r = pl.reciprocal(x, approx=True)
    return r * (2.0 - x * r)


def _logmap0_factor(y0):
    # arccosh(y0) / sqrt(y0^2 - 1), clamped exactly like the reference.
    y0 = jnp.maximum(y0, 1.0 + _CLAMP)
    d = jnp.sqrt(jnp.maximum(y0 * y0 - 1.0, _MIN_SQ))
    return jnp.log(y0 + d) * _fast_recip(d)


def _k_expmap0(u, is_time):
    # time = cosh(||u_space||), space = sinh(||u_space||)/||u_space|| * u_space.
    # `u` must already have zero time / padding columns.
    sq = jnp.sum(u * u, axis=-1, keepdims=True)
    n = jnp.maximum(jnp.sqrt(jnp.maximum(sq, _MIN_NORM * _MIN_NORM)), _MIN_NORM)
    ep = jnp.exp(n)
    en = jnp.exp(-n)                    # avoids the inf*0 NaN of a reciprocal on overflow
    cosh = 0.5 * (ep + en)
    xs = (0.5 * (ep - en) * _fast_recip(n)) * u
    return jnp.where(is_time, cosh, xs)


def _k_ln_spatial(h, gamma, beta, spatial_mask, n_spatial):
    # LayerNorm over the Lorentz spatial columns 1..out_dim-1.  `h` must already have
    # zero time / padding columns; gamma/beta are zero-padded there, so a single masked
    # `where` on diff keeps time / padding columns at zero in the result.
    inv_cnt = 1.0 / float(n_spatial)
    mean = jnp.sum(h, axis=-1, keepdims=True) * inv_cnt
    diff = jnp.where(spatial_mask, h - mean, 0.0)
    var = jnp.sum(diff * diff, axis=-1, keepdims=True) * inv_cnt
    return diff * lax.rsqrt(var + _LN_EPS) * gamma + beta


def _col_masks(d, out_dim):
    # (1, d) row masks — broadcast in the `where`s below (no full-tile iota).
    col = lax.broadcasted_iota(jnp.int32, (1, d), 1)
    is_time = col == 0
    spatial = jnp.logical_and(col >= 1, col < out_dim)
    return is_time, spatial


# ------------------------------- Pallas kernels ----------------------------------------
def _support_kernel(x_ref, wl_ref, g1_ref, b1_ref, wg_ref, o_ref, *, out_dim, precision):
    x = x_ref[...]
    d_out = o_ref.shape[-1]
    is_time, spatial = _col_masks(d_out, out_dim)

    # HypLinear: logmap0 -> linear -> proj_tan0.  w_lin row 0 / column 0 are zeroed
    # host-side, so neither u's nor v's time coordinate needs masking here; the trailing
    # expmap0 cancels against HypNorm's leading logmap0.  (bias == 0 -> transp0/expmap
    # bias branch is the identity and is folded away.)
    u = _logmap0_factor(x[:, 0:1]) * x
    v = jnp.dot(u, wl_ref[...], preferred_element_type=jnp.float32, precision=precision)

    # HypNorm ('ln'): LayerNorm on the spatial tangent coordinates.
    # (Its trailing expmap0 cancels against HypAct's leading logmap0.)
    h = _k_ln_spatial(v, g1_ref[...], b1_ref[...], spatial, out_dim - 1)

    # HypAct: ReLU in the tangent space, then map onto the manifold for GCNConv.
    y = _k_expmap0(jnp.maximum(h, 0.0), is_time)

    # First half of GCNConv: support = y @ W_gcn.
    o_ref[...] = jnp.dot(y, wg_ref[...], preferred_element_type=jnp.float32,
                         precision=precision).astype(o_ref.dtype)


def _gcn_epilogue(agg, gamma, beta, out_dim):
    # HypNorm ('ln') -> HypAct (ReLU) -> expmap0 (output lives on the manifold).
    d_out = agg.shape[-1]
    is_time, spatial = _col_masks(d_out, out_dim)
    h = jnp.where(is_time, 0.0, _logmap0_factor(agg[:, 0:1]) * agg)
    h = _k_ln_spatial(h, gamma, beta, spatial, out_dim - 1)
    return _k_expmap0(jnp.maximum(h, 0.0), is_time)


def _aggregate_resident_kernel(adj_ref, s_ref, bg_ref, g2_ref, b2_ref, o_ref, *,
                               out_dim, precision):
    # Second half of GCNConv for one adjacency row strip with `support` VMEM-resident
    # across the 1-D grid, plus the fused epilogue.
    a = adj_ref[...]
    s = s_ref[...]
    if a.dtype != s.dtype:
        s = s.astype(a.dtype)           # bf16 x bf16 single MXU pass, f32 accumulation
    agg = jnp.dot(a, s, preferred_element_type=jnp.float32, precision=precision)
    agg = agg + bg_ref[...]
    o_ref[...] = _gcn_epilogue(agg, g2_ref[...], b2_ref[...], out_dim).astype(o_ref.dtype)


def _aggregate_ktiled_kernel(adj_ref, s_ref, bg_ref, g2_ref, b2_ref, o_ref, *,
                             out_dim, precision):
    # Fallback for very large graphs: k-tiled reduction accumulated directly into the
    # resident f32 output block (no scratch); epilogue fused into the last k step.
    k = pl.program_id(1)

    @pl.when(k == 0)
    def _init():
        o_ref[...] = jnp.zeros_like(o_ref)

    a = adj_ref[...]
    s = s_ref[...]
    if a.dtype != s.dtype:
        s = s.astype(a.dtype)
    o_ref[...] += jnp.dot(a, s, preferred_element_type=jnp.float32, precision=precision)

    @pl.when(k == pl.num_programs(1) - 1)
    def _finalize():
        agg = o_ref[...] + bg_ref[...]
        o_ref[...] = _gcn_epilogue(agg, g2_ref[...], b2_ref[...], out_dim)


# ------------------------------------ wrapper ------------------------------------------
def hgc_layer(x, adj, params, *,
              adj_dtype=jnp.bfloat16,
              precision=lax.Precision.DEFAULT,
              mlp_block_nodes=None,
              agg_block_nodes=None,
              force_k_tiled=False):
    """HGCLayer forward.  x: (N, in_dim) on the Lorentz manifold, adj: (N, N) dense.

    adj_dtype:  storage / MXU dtype of the adjacency (bf16 default on every generation;
                pass 2 is adj-HBM-bandwidth-bound, accumulation stays f32).
    precision:  MXU precision for the f32 matmuls (DEFAULT = single bf16 pass; HIGHEST
                only for validation — in particular never for v5e's aggregation).
    """
    f32 = jnp.float32
    N, d_in = x.shape
    d_out = params["w_lin"].shape[1]

    d_in_p = _round_up(d_in, 128)      # lane-dense feature axes (unmasked stores / MXU)
    d_out_p = _round_up(d_out, 128)
    adj_bytes = jnp.dtype(adj_dtype).itemsize
    budget = _vmem_budget()

    # ---- pass-2 row-strip size & aggregation strategy ----------------------------------
    use_resident = True
    if force_k_tiled:
        use_resident = False
        t2 = agg_block_nodes if agg_block_nodes is not None else min(512, _round_up(N, 128))
        t2 = _round_up(t2, 16)
    elif agg_block_nodes is not None:
        t2 = _round_up(agg_block_nodes, 16)
    elif N <= 128:
        t2 = _round_up(N, 16)
    else:
        t2 = None
        for cand in (512, 256, 128):                        # biggest strip that fits VMEM
            c = min(cand, _round_up(N, 128))
            n_pc = _round_up(N, c)
            est = (2 * c * n_pc * adj_bytes                 # double-buffered adj strip
                   + 2 * n_pc * d_out_p * 4                 # resident support (f32)
                   + 2 * c * d_out_p * 4                    # output strip
                   + 8 * d_out_p * 4)                       # bias / LN params
            if est <= budget:
                t2 = c
                break
        if t2 is None:                                       # support itself no longer fits
            use_resident = False
            t2 = 512

    n_p = _round_up(N, t2)
    n_tiles2 = n_p // t2
    if not use_resident:
        assert t2 % 128 == 0 or t2 == n_p, "k-tiled adj tile must be lane-aligned"

    # ---- pass-1 row tile (kept <= 256: the (t1, d_in_p)/(t1, d_out_p) f32 intermediates
    # dominate vreg pressure; it must divide n_p) ----------------------------------------
    if mlp_block_nodes is not None:
        t1 = mlp_block_nodes
    else:
        t1 = next(c for c in (256, 128, 64, 32, 16) if n_p % c == 0)
    assert n_p % t1 == 0
    n_tiles1 = n_p // t1

    # ---- host-side padding / parameter preparation -------------------------------------
    def pad2(a, r, c):
        a = jnp.asarray(a, f32)
        return jnp.pad(a, ((0, r - a.shape[0]), (0, c - a.shape[1])))

    def pad_spatial_row(v):
        # (out_dim - 1,) LayerNorm param -> (1, d_out_p) with time / padding columns = 0.
        v = jnp.asarray(v, f32).reshape(1, -1)
        return jnp.pad(v, ((0, 0), (1, d_out_p - v.shape[1] - 1)))

    xp = pad2(x, n_p, d_in_p)
    adjp = pad2(adj, n_p, n_p).astype(adj_dtype)
    # proj_tan0 on HypLinear's input/output folded into the weight: zero row 0 & col 0.
    wl = pad2(params["w_lin"], d_in_p, d_out_p)
    wl = wl.at[0, :].set(0.0).at[:, 0].set(0.0)
    wg = pad2(params["w_gcn"], d_out_p, d_out_p)
    bg = pad2(jnp.asarray(params["b_gcn"], f32).reshape(1, -1), 1, d_out_p)
    g1 = pad_spatial_row(params["ln1_g"])
    b1 = pad_spatial_row(params["ln1_b"])
    g2 = pad_spatial_row(params["ln2_g"])
    b2 = pad_spatial_row(params["ln2_b"])

    # ---- pass 1: per-node-tile hyperbolic MLP + y @ W_gcn  ->  support ------------------
    support = pl.pallas_call(
        functools.partial(_support_kernel, out_dim=d_out, precision=precision),
        out_shape=jax.ShapeDtypeStruct((n_p, d_out_p), jnp.float32),
        grid_spec=pltpu.PrefetchScalarGridSpec(
            num_scalar_prefetch=0,
            grid=(n_tiles1,),
            in_specs=[
                pl.BlockSpec((t1, d_in_p), lambda i: (i, 0)),
                pl.BlockSpec((d_in_p, d_out_p), lambda i: (0, 0)),   # resident weight
                pl.BlockSpec((1, d_out_p), lambda i: (0, 0)),
                pl.BlockSpec((1, d_out_p), lambda i: (0, 0)),
                pl.BlockSpec((d_out_p, d_out_p), lambda i: (0, 0)),  # resident weight
            ],
            out_specs=pl.BlockSpec((t1, d_out_p), lambda i: (i, 0)),
        ),
        compiler_params=pltpu.CompilerParams(
            dimension_semantics=("parallel",),
            vmem_limit_bytes=budget,
        ),
    )(xp, wl, g1, b1, wg)

    # Aggregation matmul precision: HIGHEST is only meaningful for f32 adjacency (the
    # strict-validation path); never run HIGHEST f32 on the big adj matmul otherwise.
    agg_prec = (precision if jnp.dtype(adj_dtype) == jnp.dtype(jnp.float32)
                else lax.Precision.DEFAULT)

    # ---- pass 2: adj @ support + fused ln2 / ReLU / expmap0 epilogue --------------------
    if use_resident:
        out_p = pl.pallas_call(
            functools.partial(_aggregate_resident_kernel, out_dim=d_out,
                              precision=agg_prec),
            out_shape=jax.ShapeDtypeStruct((n_p, d_out_p), jnp.float32),
            grid_spec=pltpu.PrefetchScalarGridSpec(
                num_scalar_prefetch=0,
                grid=(n_tiles2,),                               # 1-D: row strips only
                in_specs=[
                    pl.BlockSpec((t2, n_p), lambda i: (i, 0)),        # adj row strip
                    pl.BlockSpec((n_p, d_out_p), lambda i: (0, 0)),   # resident support
                    pl.BlockSpec((1, d_out_p), lambda i: (0, 0)),
                    pl.BlockSpec((1, d_out_p), lambda i: (0, 0)),
                    pl.BlockSpec((1, d_out_p), lambda i: (0, 0)),
                ],
                out_specs=pl.BlockSpec((t2, d_out_p), lambda i: (i, 0)),
            ),
            compiler_params=pltpu.CompilerParams(
                dimension_semantics=("parallel",),
                vmem_limit_bytes=budget,
            ),
        )(adjp, support, bg, g2, b2)
    else:
        out_p = pl.pallas_call(
            functools.partial(_aggregate_ktiled_kernel, out_dim=d_out,
                              precision=agg_prec),
            out_shape=jax.ShapeDtypeStruct((n_p, d_out_p), jnp.float32),
            grid_spec=pltpu.PrefetchScalarGridSpec(
                num_scalar_prefetch=0,
                grid=(n_tiles2, n_tiles2),                      # reduction (k) axis last
                in_specs=[
                    pl.BlockSpec((t2, t2), lambda i, k: (i, k)),
                    pl.BlockSpec((t2, d_out_p), lambda i, k: (k, 0)),
                    pl.BlockSpec((1, d_out_p), lambda i, k: (0, 0)),
                    pl.BlockSpec((1, d_out_p), lambda i, k: (0, 0)),
                    pl.BlockSpec((1, d_out_p), lambda i, k: (0, 0)),
                ],
                out_specs=pl.BlockSpec((t2, d_out_p), lambda i, k: (i, 0)),
            ),
            compiler_params=pltpu.CompilerParams(
                dimension_semantics=("parallel", "arbitrary"),
                vmem_limit_bytes=budget,
            ),
        )(adjp, support, bg, g2, b2)

    return out_p[:N, :d_out]


# -------------------------- pure-JAX reference (original, uncancelled chain) ------------
def _ref_zero_time(u):
    return jnp.concatenate([jnp.zeros_like(u[..., :1]), u[..., 1:]], axis=-1)


def _ref_logmap0(y):
    y0 = jnp.maximum(y[..., 0:1], 1.0 + _CLAMP)
    d = jnp.sqrt(jnp.maximum(y0 * y0 - 1.0, _MIN_SQ))
    return _ref_zero_time((jnp.log(y0 + d) / d) * y)


def _ref_expmap0(u):
    us = _ref_zero_time(u)
    n = jnp.sqrt(jnp.maximum(jnp.sum(us * us, axis=-1, keepdims=True),
                             _MIN_NORM * _MIN_NORM))
    n = jnp.maximum(n, _MIN_NORM)
    e = jnp.exp(n)
    cosh = 0.5 * (e + 1.0 / e)
    sinh = 0.5 * (e - 1.0 / e)
    return jnp.concatenate([cosh, (sinh / n) * us[..., 1:]], axis=-1)


def _ref_ln_spatial(h, gamma, beta):
    hs = h[..., 1:]
    mean = jnp.mean(hs, axis=-1, keepdims=True)
    var = jnp.mean((hs - mean) ** 2, axis=-1, keepdims=True)
    normed = (hs - mean) / jnp.sqrt(var + _LN_EPS)
    return jnp.concatenate([h[..., :1], normed * gamma + beta], axis=-1)


def hgc_layer_ref(x, adj, p):
    dot = functools.partial(jnp.dot, precision=lax.Precision.HIGHEST)
    # HNNLayer / HypLinear (bias == 0 -> transp0/expmap bias branch is the identity)
    y = _ref_expmap0(_ref_zero_time(dot(_ref_logmap0(x), p["w_lin"])))
    # HNNLayer / HypNorm ('ln')
    y = _ref_expmap0(_ref_ln_spatial(_ref_logmap0(y), p["ln1_g"], p["ln1_b"]))
    # HNNLayer / HypAct (ReLU)
    y = _ref_expmap0(_ref_zero_time(jnp.maximum(_ref_logmap0(y), 0.0)))
    # GCNConv
    agg = dot(adj, dot(y, p["w_gcn"])) + p["b_gcn"]
    # HGCLayer / HypNorm ('ln')
    y = _ref_expmap0(_ref_ln_spatial(_ref_logmap0(agg), p["ln2_g"], p["ln2_b"]))
    # HGCLayer / HypAct (ReLU)
    y = _ref_expmap0(_ref_zero_time(jnp.maximum(_ref_logmap0(y), 0.0)))
    return y


# ------------------------------------- demo --------------------------------------------
def _make_example(key, n, in_dim, out_dim):
    f32 = jnp.float32
    ks = jax.random.split(key, 8)
    # Input on the Lorentz manifold: time = sqrt(1 + ||space||^2).
    x_space = jax.random.normal(ks[0], (n, in_dim - 1), dtype=f32)
    x_time = jnp.sqrt(1.0 + jnp.sum(x_space * x_space, axis=-1, keepdims=True))
    x = jnp.concatenate([x_time, x_space], axis=-1)
    # Dense symmetric normalised adjacency with self loops.
    a = (jax.random.uniform(ks[1], (n, n)) < 0.4).astype(f32)
    a = jnp.clip(a + a.T + jnp.eye(n, dtype=f32), 0.0, 1.0)
    dinv = 1.0 / jnp.sqrt(jnp.sum(a, axis=-1))
    adj = a * dinv[:, None] * dinv[None, :]

    params = {
        # nn.Linear(in_dim, out_dim, bias=False).weight.T
        "w_lin": (jax.random.uniform(ks[2], (in_dim, out_dim), minval=-1.0, maxval=1.0)
                  / jnp.sqrt(float(in_dim))).astype(f32),
        # nn.LayerNorm(out_dim - 1) params (moderate scales keep the expmap0
        # amplification well-conditioned for the numerical comparison).
        "ln1_g": 0.3 + 0.05 * jax.random.normal(ks[3], (out_dim - 1,), dtype=f32),
        "ln1_b": 0.05 * jax.random.normal(ks[4], (out_dim - 1,), dtype=f32),
        # GCNConv(out_dim, out_dim) weight / bias
        "w_gcn": (jax.random.uniform(ks[5], (out_dim, out_dim), minval=-1.0, maxval=1.0)
                  / jnp.sqrt(float(out_dim))).astype(f32),
        "b_gcn": 0.1 * jax.random.normal(ks[6], (out_dim,), dtype=f32),
        "ln2_g": 0.3 + 0.05 * jax.random.normal(ks[7], (out_dim - 1,), dtype=f32),
        "ln2_b": jnp.zeros((out_dim - 1,), f32),
    }
    return x, adj, params


if __name__ == "__main__":
    key = jax.random.PRNGKey(0)
    k1, k2 = jax.random.split(key)

    # Case 1: strict numerics (f32 adjacency + HIGHEST MXU), tiny single-tile problem.
    x1, adj1, p1 = _make_example(k1, 8, 32, 32)
    out1 = jax.block_until_ready(
        hgc_layer(x1, adj1, p1, adj_dtype=jnp.float32, precision=lax.Precision.HIGHEST))
    ref1 = hgc_layer_ref(x1, adj1, p1)
    assert out1.shape == ref1.shape and out1.dtype == jnp.float32
    assert bool(jnp.all(jnp.isfinite(out1)))
    assert bool(jnp.allclose(out1, ref1, rtol=2e-3, atol=2e-2)), "strict f32 mismatch"

    # Case 2: default fast path (bf16 adjacency, DEFAULT-precision MXU, resident
    # support).  N=300 -> 384 padded rows, pass-1 tiles of 128, one 384-row adj strip.
    x2, adj2, p2 = _make_example(k2, 300, 160, 72)
    ref2 = hgc_layer_ref(x2, adj2, p2)
    out2 = jax.block_until_ready(hgc_layer(x2, adj2, p2))
    assert out2.shape == ref2.shape
    assert bool(jnp.all(jnp.isfinite(out2)))
    err2 = float(jnp.max(jnp.abs(out2 - ref2)) / jnp.max(jnp.abs(ref2)))
    assert err2 < 0.05, f"fast path deviates too much: {err2}"

    # Case 3: multi-strip 1-D aggregation (resident support, 3 row strips of 128 nodes).
    out3 = jax.block_until_ready(hgc_layer(x2, adj2, p2, agg_block_nodes=128))
    assert bool(jnp.all(jnp.isfinite(out3)))
    err3 = float(jnp.max(jnp.abs(out3 - ref2)) / jnp.max(jnp.abs(ref2)))
    assert err3 < 0.05, f"multi-strip path deviates too much: {err3}"

    # Case 4: forced k-tiled fallback (the path used when support + an adj strip no
    # longer fit in VMEM for very large graphs); exercises in-place output accumulation.
    out4 = jax.block_until_ready(
        hgc_layer(x2, adj2, p2, agg_block_nodes=128, force_k_tiled=True))
    assert bool(jnp.all(jnp.isfinite(out4)))
    err4 = float(jnp.max(jnp.abs(out4 - ref2)) / jnp.max(jnp.abs(ref2)))
    assert err4 < 0.05, f"k-tiled fallback deviates too much: {err4}"

    print("KERNEL_OK")
</pallas_src>

<mosaic_0001>
module attributes {stable_mosaic.version = 11 : i64} {
  func.func @_support_kernel(%arg0: i32, %arg1: memref<16x128xf32, #tpu.memory_space<vmem>>, %arg2: memref<128x128xf32, #tpu.memory_space<vmem>>, %arg3: memref<1x128xf32, #tpu.memory_space<vmem>>, %arg4: memref<1x128xf32, #tpu.memory_space<vmem>>, %arg5: memref<128x128xf32, #tpu.memory_space<vmem>>, %arg6: memref<16x128xf32, #tpu.memory_space<vmem>>) attributes {dimension_semantics = [#tpu.dimension_semantics<parallel>], iteration_bounds = array<i64: 1>, scalar_prefetch = 0 : i64, scratch_operands = 0 : i64, tpu.core_type = #tpu.core_type<tc>, window_params = [{transform_indices = @transform_0, window_bounds = array<i64: 16, 128>}, {pipeline_mode = #tpu.pipeline_mode<synchronous>, transform_indices = @transform_1, window_bounds = array<i64: 128, 128>}, {pipeline_mode = #tpu.pipeline_mode<synchronous>, transform_indices = @transform_2, window_bounds = array<i64: 1, 128>}, {pipeline_mode = #tpu.pipeline_mode<synchronous>, transform_indices = @transform_3, window_bounds = array<i64: 1, 128>}, {pipeline_mode = #tpu.pipeline_mode<synchronous>, transform_indices = @transform_4, window_bounds = array<i64: 128, 128>}, {transform_indices = @transform_5, window_bounds = array<i64: 16, 128>}]} {
    %c0 = arith.constant 0 : index
    %c0_0 = arith.constant 0 : index
    %0 = vector.load %arg1[%c0, %c0_0] : memref<16x128xf32, #tpu.memory_space<vmem>>, vector<16x128xf32>
    %1 = tpu.iota {dimensions = array<i32: 1>} : vector<1x128xi32>
    %c0_i32 = arith.constant 0 : i32
    %2 = vector.broadcast %c0_i32 : i32 to vector<1x128xi32>
    %3 = arith.cmpi eq, %1, %2 : vector<1x128xi32>
    %c1_i32 = arith.constant 1 : i32
    %4 = vector.broadcast %c1_i32 : i32 to vector<1x128xi32>
    %5 = arith.cmpi sge, %1, %4 : vector<1x128xi32>
    %c32_i32 = arith.constant 32 : i32
    %6 = vector.broadcast %c32_i32 : i32 to vector<1x128xi32>
    %7 = arith.cmpi slt, %1, %6 : vector<1x128xi32>
    %8 = arith.andi %5, %7 : vector<1x128xi1>
    %9 = vector.extract_strided_slice %0 {offsets = [0, 0], sizes = [16, 1], strides = [1, 1]} : vector<16x128xf32> to vector<16x1xf32>
    %cst = arith.constant 1.00000095 : f32
    %10 = vector.broadcast %cst : f32 to vector<16x1xf32>
    %11 = arith.maximumf %9, %10 : vector<16x1xf32>
    %12 = arith.mulf %11, %11 : vector<16x1xf32>
    %cst_1 = arith.constant 1.000000e+00 : f32
    %13 = vector.broadcast %cst_1 : f32 to vector<16x1xf32>
    %14 = arith.subf %12, %13 : vector<16x1xf32>
    %cst_2 = arith.constant 1.000000e-07 : f32
    %15 = vector.broadcast %cst_2 : f32 to vector<16x1xf32>
    %16 = arith.maximumf %14, %15 : vector<16x1xf32>
    %17 = math.sqrt %16 : vector<16x1xf32>
    %18 = arith.addf %11, %17 : vector<16x1xf32>
    %19 = math.log %18 : vector<16x1xf32>
    %20 = tpu.reciprocal %17 {approx = true} : vector<16x1xf32> -> vector<16x1xf32>
    %21 = arith.mulf %17, %20 : vector<16x1xf32>
    %cst_3 = arith.constant 2.000000e+00 : f32
    %22 = vector.broadcast %cst_3 : f32 to vector<16x1xf32>
    %23 = arith.subf %22, %21 : vector<16x1xf32>
    %24 = arith.mulf %20, %23 : vector<16x1xf32>
    %25 = arith.mulf %19, %24 : vector<16x1xf32>
    %26 = vector.broadcast %25 : vector<16x1xf32> to vector<16x128xf32>
    %27 = arith.mulf %26, %0 : vector<16x128xf32>
    %c0_4 = arith.constant 0 : index
    %c0_5 = arith.constant 0 : index
    %28 = vector.load %arg2[%c0_4, %c0_5] : memref<128x128xf32, #tpu.memory_space<vmem>>, vector<128x128xf32>
    %cst_6 = arith.constant dense<0.000000e+00> : vector<16x128xf32>
    %29 = tpu.matmul %27, %28, %cst_6 {dimension_numbers = #tpu.dot_dimension_numbers<[1], [0], [0], [1], [0, 0, 1, 1], [], []>, precision = #tpu.contract_precision<fp32>} : vector<16x128xf32>, vector<128x128xf32>, vector<16x128xf32> -> vector<16x128xf32>
    %c0_7 = arith.constant 0 : index
    %c0_8 = arith.constant 0 : index
    %30 = vector.load %arg3[%c0_7, %c0_8] : memref<1x128xf32, #tpu.memory_space<vmem>>, vector<1x128xf32>
    %c0_9 = arith.constant 0 : index
    %c0_10 = arith.constant 0 : index
    %31 = vector.load %arg4[%c0_9, %c0_10] : memref<1x128xf32, #tpu.memory_space<vmem>>, vector<1x128xf32>
    %cst_11 = arith.constant dense<0.000000e+00> : vector<16xf32>
    %32 = vector.multi_reduction <add>, %29, %cst_11 [1] : vector<16x128xf32> to vector<16xf32>
    %33 = vector.shape_cast %32 : vector<16xf32> to vector<16x1xf32>
    %cst_12 = arith.constant 0.0322580636 : f32
    %34 = vector.broadcast %cst_12 : f32 to vector<16x1xf32>
    %35 = arith.mulf %33, %34 : vector<16x1xf32>
    %36 = vector.broadcast %35 : vector<16x1xf32> to vector<16x128xf32>
    %37 = arith.subf %29, %36 : vector<16x128xf32>
    %cst_13 = arith.constant 0.000000e+00 : f32
    %38 = vector.shape_cast %8 : vector<1x128xi1> to vector<1x128xi1>
    %39 = vector.broadcast %38 : vector<1x128xi1> to vector<16x128xi1>
    %40 = vector.broadcast %cst_13 : f32 to vector<16x128xf32>
    %41 = arith.select %39, %37, %40 : vector<16x128xi1>, vector<16x128xf32>
    %42 = arith.mulf %41, %41 : vector<16x128xf32>
    %cst_14 = arith.constant dense<0.000000e+00> : vector<16xf32>
    %43 = vector.multi_reduction <add>, %42, %cst_14 [1] : vector<16x128xf32> to vector<16xf32>
    %44 = vector.shape_cast %43 : vector<16xf32> to vector<16x1xf32>
    %cst_15 = arith.constant 0.0322580636 : f32
    %45 = vector.broadcast %cst_15 : f32 to vector<16x1xf32>
    %46 = arith.mulf %44, %45 : vector<16x1xf32>
    %cst_16 = arith.constant 9.99999974E-6 : f32
    %47 = vector.broadcast %cst_16 : f32 to vector<16x1xf32>
    %48 = arith.addf %46, %47 : vector<16x1xf32>
    %49 = math.rsqrt %48 : vector<16x1xf32>
    %50 = vector.broadcast %49 : vector<16x1xf32> to vector<16x128xf32>
    %51 = arith.mulf %41, %50 : vector<16x128xf32>
    %52 = vector.broadcast %30 : vector<1x128xf32> to vector<16x128xf32>
    %53 = arith.mulf %51, %52 : vector<16x128xf32>
    %54 = vector.broadcast %31 : vector<1x128xf32> to vector<16x128xf32>
    %55 = arith.addf %53, %54 : vector<16x128xf32>
    %cst_17 = arith.constant 0.000000e+00 : f32
    %56 = vector.broadcast %cst_17 : f32 to vector<16x128xf32>
    %57 = arith.maximumf %55, %56 : vector<16x128xf32>
    %58 = arith.mulf %57, %57 : vector<16x128xf32>
    %cst_18 = arith.constant dense<0.000000e+00> : vector<16xf32>
    %59 = vector.multi_reduction <add>, %58, %cst_18 [1] : vector<16x128xf32> to vector<16xf32>
    %60 = vector.shape_cast %59 : vector<16xf32> to vector<16x1xf32>
    %cst_19 = arith.constant 1.000000e-16 : f32
    %61 = vector.broadcast %cst_19 : f32 to vector<16x1xf32>
    %62 = arith.maximumf %60, %61 : vector<16x1xf32>
    %63 = math.sqrt %62 : vector<16x1xf32>
    %cst_20 = arith.constant 9.99999993E-9 : f32
    %64 = vector.broadcast %cst_20 : f32 to vector<16x1xf32>
    %65 = arith.maximumf %63, %64 : vector<16x1xf32>
    %66 = math.exp %65 : vector<16x1xf32>
    %cst_21 = arith.constant 0.000000e+00 : f32
    %67 = vector.broadcast %cst_21 : f32 to vector<16x1xf32>
    %68 = arith.subf %67, %65 : vector<16x1xf32>
    %69 = math.exp %68 : vector<16x1xf32>
    %70 = arith.addf %66, %69 : vector<16x1xf32>
    %cst_22 = arith.constant 5.000000e-01 : f32
    %71 = vector.broadcast %cst_22 : f32 to vector<16x1xf32>
    %72 = arith.mulf %71, %70 : vector<16x1xf32>
    %73 = arith.subf %66, %69 : vector<16x1xf32>
    %cst_23 = arith.constant 5.000000e-01 : f32
    %74 = vector.broadcast %cst_23 : f32 to vector<16x1xf32>
    %75 = arith.mulf %74, %73 : vector<16x1xf32>
    %76 = tpu.reciprocal %65 {approx = true} : vector<16x1xf32> -> vector<16x1xf32>
    %77 = arith.mulf %65, %76 : vector<16x1xf32>
    %cst_24 = arith.constant 2.000000e+00 : f32
    %78 = vector.broadcast %cst_24 : f32 to vector<16x1xf32>
    %79 = arith.subf %78, %77 : vector<16x1xf32>
    %80 = arith.mulf %76, %79 : vector<16x1xf32>
    %81 = arith.mulf %75, %80 : vector<16x1xf32>
    %82 = vector.broadcast %81 : vector<16x1xf32> to vector<16x128xf32>
    %83 = arith.mulf %82, %57 : vector<16x128xf32>
    %84 = vector.shape_cast %3 : vector<1x128xi1> to vector<1x128xi1>
    %85 = vector.broadcast %84 : vector<1x128xi1> to vector<16x128xi1>
    %86 = vector.shape_cast %72 : vector<16x1xf32> to vector<16x1xf32>
    %87 = vector.broadcast %86 : vector<16x1xf32> to vector<16x128xf32>
    %88 = arith.select %85, %87, %83 : vector<16x128xi1>, vector<16x128xf32>
    %c0_25 = arith.constant 0 : index
    %c0_26 = arith.constant 0 : index
    %89 = vector.load %arg5[%c0_25, %c0_26] : memref<128x128xf32, #tpu.memory_space<vmem>>, vector<128x128xf32>
    %cst_27 = arith.constant dense<0.000000e+00> : vector<16x128xf32>
    %90 = tpu.matmul %88, %89, %cst_27 {dimension_numbers = #tpu.dot_dimension_numbers<[1], [0], [0], [1], [0, 0, 1, 1], [], []>, precision = #tpu.contract_precision<fp32>} : vector<16x128xf32>, vector<128x128xf32>, vector<16x128xf32> -> vector<16x128xf32>
    %c0_28 = arith.constant 0 : index
    %c0_29 = arith.constant 0 : index
    %91 = vector.load %arg6[%c0_28, %c0_29] : memref<16x128xf32, #tpu.memory_space<vmem>>, vector<16x128xf32>
    tpu.vector_store %arg6[%c0_28, %c0_29], %90 {strides = array<i32>} : memref<16x128xf32, #tpu.memory_space<vmem>>, vector<16x128xf32>,
    return
  }
  func.func @transform_0(%arg0: i32) -> (i32, i32) {
    %c0_i32 = arith.constant 0 : i32
    %c0_i32_0 = arith.constant 0 : i32
    return %arg0, %c0_i32 : i32, i32
  }
  func.func @transform_1(%arg0: i32) -> (i32, i32) {
    %c0_i32 = arith.constant 0 : i32
    %c0_i32_0 = arith.constant 0 : i32
    %c0_i32_1 = arith.constant 0 : i32
    return %c0_i32, %c0_i32_0 : i32, i32
  }
  func.func @transform_2(%arg0: i32) -> (i32, i32) {
    %c0_i32 = arith.constant 0 : i32
    %c0_i32_0 = arith.constant 0 : i32
    %c0_i32_1 = arith.constant 0 : i32
    return %c0_i32, %c0_i32_0 : i32, i32
  }
  func.func @transform_3(%arg0: i32) -> (i32, i32) {
    %c0_i32 = arith.constant 0 : i32
    %c0_i32_0 = arith.constant 0 : i32
    %c0_i32_1 = arith.constant 0 : i32
    return %c0_i32, %c0_i32_0 : i32, i32
  }
  func.func @transform_4(%arg0: i32) -> (i32, i32) {
    %c0_i32 = arith.constant 0 : i32
    %c0_i32_0 = arith.constant 0 : i32
    %c0_i32_1 = arith.constant 0 : i32
    return %c0_i32, %c0_i32_0 : i32, i32
  }
  func.func @transform_5(%arg0: i32) -> (i32, i32) {
    %c0_i32 = arith.constant 0 : i32
    %c0_i32_0 = arith.constant 0 : i32
    return %arg0, %c0_i32 : i32, i32
  }
}

</mosaic_0001>

<bundles_post_ra>
// kernel: tpu_custom_call.1
= control target key start
LH: loop header
LB: loop body
LE: loop exit
PB: predicated region body
PF: predicated region fallthrough
CT: control target
= control target key end

     0   :  { %10 = vsyncpa [#allocation3], 0  ;;  %s3677_s0 = inlined_call_operand.hbm [shape: f32[16,128], index: 0, kind: input, shape index: {}]   ;;  %s3678_s1 = inlined_call_operand.hbm [shape: f32[128,128], index: 1, kind: input, shape index: {}]   ;;  %s3679_s2 = inlined_call_operand.vmem [shape: f32[1,128], index: 2, kind: input, shape index: {}]   ;;  %s3680_s3 = inlined_call_operand.vmem [shape: f32[1,128], index: 3, kind: input, shape index: {}]   ;;  %s3681_s4 = inlined_call_operand.hbm [shape: f32[128,128], index: 4, kind: input, shape index: {}]   ;;  %s3682_s5 = inlined_call_operand.hbm [shape: f32[16,128], index: 5, kind: output, shape index: {}]  }
   0x1   :  { %11 = vsyncpa [#allocation6], 0 }
   0x2   :  { %12 = vsyncpa [#allocation4], 0  ;;  %s2822_s18 = smov [#allocation5]   ;;  %s2823_s20 = smov [#allocation2]  }
   0x3   :  { %s30_s19 = sshll.u32 %s2822_s18, 4  ;;  %s18_s21 = sshll.u32 %s2823_s20, 4  ;;  %s31_s19 = int_to_ptr.vmem [resolvable:$true] %s30_s19  ;;  %s2859_s21 = int_to_ptr.vmem [resolvable:$true] %s18_s21 }
   0x4   :  { %s2728_s24 = scalar_lea.hbm %s3678_s1, 2048 }
   0x5   :  { %p2729_p0 = scmp.ne.s32.totalorder %s3678_s1, %s2728_s24  ;;  %p2732_p1 = scmp.lt.u32.totalorder %s2728_s24, %s3678_s1 }
   0x7   :  { %p2734_p2 = pnand %p2732_p1, %p2729_p0 }
   0x9   :  { %2737 = shalt.err (!%p2734_p2)
}
   0xa   :  { %s2738_s29 = scalar_lea.vmem %s31_s19, 2048  ;;  %p2743_p4 = scmp.lt.s32.totalorder %s31_s19, %s31_s19 }
   0xb   :  { %p2739_p3 = scmp.ne.s32.totalorder %s31_s19, %s2738_s29  ;;  %p2744_p5 = scmp.lt.s32.totalorder %s2738_s29, %s2738_s29 }
   0xd   :  { %p2745_p6 = por %p2744_p5, %p2743_p4 }
   0xf   :  { %p2746_p7 = pnand %p2745_p6, %p2739_p3 }
  0x11   :  { %2749 = shalt.err (!%p2746_p7)
}
  0x12   :  { %s2824_s30 = smov 128   ;;  %s2825_s6 = smov 8  }
  0x13   :  { %36 = dma.hbm_to_vmem [thread:$0]  %s3678_s1, 2048, %s31_s19, [#allocation6], %s2824_s30, %s2824_s30, %s2825_s6  }
  0x14   :  { %s2750_s11 = scalar_lea.hbm %s3677_s0, 256 }
  0x15   :  { %p2751_p8 = scmp.ne.s32.totalorder %s3677_s0, %s2750_s11  ;;  %p2754_p9 = scmp.lt.u32.totalorder %s2750_s11, %s3677_s0 }
  0x17   :  { %p2756_p10 = pnand %p2754_p9, %p2751_p8 }
  0x19   :  { %2759 = shalt.err (!%p2756_p10)
}
  0x1a   :  { %s2760_s16 = scalar_lea.vmem %s2859_s21, 256  ;;  %p2765_p12 = scmp.lt.s32.totalorder %s2859_s21, %s2859_s21 }
  0x1b   :  { %p2761_p11 = scmp.ne.s32.totalorder %s2859_s21, %s2760_s16  ;;  %p2766_p13 = scmp.lt.s32.totalorder %s2760_s16, %s2760_s16 }
  0x1d   :  { %p2767_p0 = por %p2766_p13, %p2765_p12 }
  0x1f   :  { %p2768_p1 = pnand %p2767_p0, %p2761_p11 }
  0x21   :  { %2771 = shalt.err (!%p2768_p1)
}
  0x22   :  { %24 = dma.hbm_to_vmem [thread:$0]  %s3677_s0, 256, %s2859_s21, [#allocation3], %s2824_s30, %s2824_s30, %s2825_s6  }
  0x23   :  { %s2826_s18 = smov [#allocation7]   ;;  %s2772_s23 = scalar_lea.hbm %s3681_s4, 2048 }
  0x24   :  { %s46_s19 = sshll.u32 %s2826_s18, 4  ;;  %p2773_p2 = scmp.ne.s32.totalorder %s3681_s4, %s2772_s23  ;;  %s47_s19 = int_to_ptr.vmem [resolvable:$true] %s46_s19 }
  0x25   :  { %p2776_p3 = scmp.lt.u32.totalorder %s2772_s23, %s3681_s4 }
  0x27   :  { %p2778_p4 = pnand %p2776_p3, %p2773_p2 }
  0x29   :  { %2781 = shalt.err (!%p2778_p4)
}
  0x2a   :  { %s2782_s28 = scalar_lea.vmem %s47_s19, 2048  ;;  %p2787_p6 = scmp.lt.s32.totalorder %s47_s19, %s47_s19 }
  0x2b   :  { %p2783_p5 = scmp.ne.s32.totalorder %s47_s19, %s2782_s28  ;;  %p2788_p7 = scmp.lt.s32.totalorder %s2782_s28, %s2782_s28 }
  0x2d   :  { %p2789_p8 = por %p2788_p7, %p2787_p6 }
  0x2f   :  { %p2790_p9 = pnand %p2789_p8, %p2783_p5 }
  0x31   :  { %2793 = shalt.err (!%p2790_p9)
}
  0x32   :  { %52 = dma.hbm_to_vmem [thread:$0]  %s3681_s4, 2048, %s47_s19, [#allocation6], %s2824_s30, %s2824_s30, %s2825_s6  }
  0x33   :  { %2816 = dma.done.wait [#allocation3], 256  }
  0x34   :  { %2817 = vsyncadd [#allocation3], 4294967040 }
  0x35   :  { %2818 = dma.done.wait [#allocation6], 4096  }
  0x36   :  { %2819 = vsyncadd [#allocation6], 4294963200  ;;  %v2827_v0 = vmov 0   ;;  %v2911_v1 = vld [vmem:[#allocation2] sm:$0xff]  ;;  %v2913_v2 = vld [vmem:[#allocation2 + $0x8] sm:$0xff] }
  0x37   :  { %2695 = vset.pattern.permute.xlu0 %v2827_v0  ;;  %v2915_v3 = vld [vmem:[#allocation5] sm:$0xff]  ;;  %v70_v4 = vmax.f32 %v2911_v1, 1.000001  ;;  %v71_v5 = vmax.f32 %v2913_v2, 1.000001  ;;  %v2919_v6 = vld [vmem:[#allocation5 + $0x8] sm:$0xff] }
  0x38   :  { %v137_v7 = vand.u32 4294901760, %v2915_v3  ;;  %v140_v8 = vand.u32 4294901760, %v2919_v6  ;;  %v2923_v9 = vld [vmem:[#allocation5 + $0x10] sm:$0xff]  ;;  %v2925_v10 = vld [vmem:[#allocation5 + $0x18] sm:$0xff]  ;;  %v2927_v11 = vld [vmem:[#allocation5 + $0x20] sm:$0xff] }
  0x39   :  { %v72_v12 = vmul.f32 %v70_v4, %v70_v4  ;;  %v73_v13 = vmul.f32 %v71_v5, %v71_v5  ;;  %v143_v14 = vand.u32 4294901760, %v2923_v9  ;;  %v146_v15 = vand.u32 4294901760, %v2925_v10  ;;  %v2931_v16 = vld [vmem:[#allocation5 + $0x28] sm:$0xff]  ;;  %v2947_v23 = vld [vmem:[#allocation5 + $0x30] sm:$0xff]  ;;  %v2949_v24 = vld [vmem:[#allocation5 + $0x38] sm:$0xff] }
  0x3a   :  { %v2937_v17 = vpack.c.bf16 %v140_v8, %v137_v7  ;;  %v149_v18 = vand.u32 4294901760, %v2927_v11  ;;  %v152_v19 = vand.u32 4294901760, %v2931_v16  ;;  %v155_v28 = vand.u32 4294901760, %v2947_v23  ;;  %v2962_v30 = vld [vmem:[#allocation5 + $0x40] sm:$0xff]  ;;  %v2964_v31 = vld [vmem:[#allocation5 + $0x48] sm:$0xff]  ;;  %v2987_v61 = vld [vmem:[#allocation5 + $0x50] sm:$0xff] }
  0x3b   :  { %v1644_v20 = vadd.f32 -1.0, %v72_v12  ;;  %v1645_v21 = vadd.f32 -1.0, %v73_v13  ;;  %v2945_v22 = vpack.c.bf16 %v146_v15, %v143_v14  ;;  %v158_v29 = vand.u32 4294901760, %v2949_v24  ;;  %v2989_v62 = vld [vmem:[#allocation5 + $0x58] sm:$0xff]  ;;  %v2999_v12 = vld [vmem:[#allocation5 + $0x60] sm:$0xff]  ;;  %v3001_v13 = vld [vmem:[#allocation5 + $0x68] sm:$0xff] }
  0x3c   :  { %2285 = vmatprep.subr.bf16.mxu0 %v2937_v17  ;;  %v2958_v27 = vpack.c.bf16 %v152_v19, %v149_v18  ;;  %v161_v33 = vand.u32 4294901760, %v2962_v30  ;;  %v164_v34 = vand.u32 4294901760, %v2964_v31  ;;  %v167_v63 = vand.u32 4294901760, %v2987_v61 }
  0x3d   :  { %v76_v25 = vmax.f32 %v1644_v20, 1e-07  ;;  %v77_v26 = vmax.f32 %v1645_v21, 1e-07  ;;  %2287 = vmatpush3.bf16.msra.mxu0 %v2937_v17  ;;  %v2972_v32 = vpack.c.bf16 %v158_v29, %v155_v28  ;;  %v170_v0 = vand.u32 4294901760, %v2989_v62 }
  0x3e   :  { %2289 = vmatprep.subr.bf16.mxu0 %v2945_v22  ;;  %v2982_v35 = vpack.c.bf16 %v164_v34, %v161_v33  ;;  %v173_v20 = vand.u32 4294901760, %v2999_v12  ;;  %v176_v21 = vand.u32 4294901760, %v3001_v13 }
  0x3f   :  { %2696 = vrsqrt.f32 %v76_v25  ;;  %vm80_vm0 = vcmp.eq.f32.partialorder %v76_v25, inf  ;;  %v83_v37 = vand.u32 2147483648, %v76_v25  ;;  %vm82_vm1 = vcmp.eq.f32.partialorder %v76_v25, 0.0 }
  0x40   :  { %2698 = vrsqrt.f32 %v77_v26  ;;  %vm87_vm2 = vcmp.eq.f32.partialorder %v77_v26, inf  ;;  %v90_v40 = vand.u32 2147483648, %v77_v26  ;;  %vm89_vm3 = vcmp.eq.f32.partialorder %v77_v26, 0.0 }
  0x41   :  { %2291 = vmatpush3.bf16.msra.mxu0 %v2945_v22 }
  0x42   :  { %2293 = vmatprep.subr.bf16.mxu0 %v2958_v27 }
  0x45   :  { %2295 = vmatpush3.bf16.msra.mxu0 %v2958_v27 }
  0x46   :  { %2297 = vmatprep.subr.bf16.mxu0 %v2972_v32 }
  0x49   :  { %v2697_v36 = vpop.eup %2696  ;;  %2299 = vmatpush3.bf16.msra.mxu0 %v2972_v32 }
  0x4a   :  { %v2699_v38 = vpop.eup %2698  ;;  %v79_v39 = vmul.f32 %v2697_v36, %v76_v25  ;;  %2301 = vmatprep.subr.bf16.mxu0 %v2982_v35  ;;  %v3021_v36 = vsub.f32 %v2919_v6, %v140_v8 }
  0x4b   :  { %v86_v41 = vmul.f32 %v2699_v38, %v77_v26  ;;  %v3025_v38 = vld [vmem:[#allocation5 + $0x78] sm:$0xff] }
  0x4c   :  { %v81_v42 = vsel %vm80_vm0, %v76_v25, %v79_v39  ;;  %v3011_v25 = vpack.c.bf16 %v176_v21, %v173_v20 }
  0x4d   :  { %v84_v43 = vsel %vm82_vm1, %v83_v37, %v81_v42  ;;  %v88_v44 = vsel %vm87_vm2, %v77_v26, %v86_v41  ;;  %2303 = vmatpush3.bf16.msra.mxu0 %v2982_v35  ;;  %v3016_v26 = vsub.f32 %v2915_v3, %v137_v7  ;;  %v3023_v37 = vld [vmem:[#allocation5 + $0x70] sm:$0xff]  ;;  %v247_v3 = vand.u32 4294901760, %v3021_v36 }
  0x4e   :  { %v92_v45 = vadd.f32 %v84_v43, %v70_v4  ;;  %2700 = vrcp.f32 %v84_v43  ;;  %v91_v46 = vsel %vm89_vm3, %v90_v40, %v88_v44  ;;  %v179_v39 = vand.u32 4294901760, %v3023_v37 }
  0x4f   :  { %v93_v47 = vadd.f32 %v91_v46, %v71_v5  ;;  %2702 = vrcp.f32 %v91_v46  ;;  %v2997_v5 = vpack.c.bf16 %v170_v0, %v167_v63  ;;  %v182_v40 = vand.u32 4294901760, %v3025_v38 }
  0x50   :  { %2704 = vlog2.f32 %v92_v45  ;;  %v240_v41 = vand.u32 4294901760, %v3016_v26  ;;  %v248_v8 = vsub.f32 %v3021_v36, %v247_v3  ;;  %v3048_v42 = vsub.f32 %v2923_v9, %v143_v14 }
  0x51   :  { %2706 = vlog2.f32 %v93_v47  ;;  %2305 = vmatprep.subr.bf16.mxu0 %v2997_v5  ;;  %v3037_v6 = vpack.c.bf16 %v182_v40, %v179_v39  ;;  %v3070_v14 = vsub.f32 %v2927_v11, %v149_v18 }
  0x52   :  { %2307 = vmatpush3.bf16.msra.mxu0 %v2997_v5  ;;  %v241_v7 = vsub.f32 %v3016_v26, %v240_v41  ;;  %v249_v45 = vand.u32 4294901760, %v248_v8 }
  0x53   :  { %2309 = vmatprep.subr.bf16.mxu0 %v3011_v25 }
  0x54   :  { %v242_v44 = vand.u32 4294901760, %v241_v7 }
  0x56   :  { %2311 = vmatpush3.bf16.msra.mxu0 %v3011_v25 }
  0x57   :  { %2313 = vmatprep.subr.bf16.mxu0 %v3037_v6 }
  0x58   :  { %v2701_v48 = vpop.eup %2700 }
  0x59   :  { %v2703_v49 = vpop.eup %2702  ;;  %v100_v50 = vmul.f32 %v2701_v48, %v84_v43  ;;  %v3053_v43 = vsub.f32 %v2925_v10, %v146_v15  ;;  %v3075_v15 = vsub.f32 %v2931_v16, %v152_v19  ;;  %v3091_v16 = vsub.f32 %v2947_v23, %v155_v28 }
  0x5a   :  { %v2705_v51 = vpop.eup %2704  ;;  %v101_v52 = vmul.f32 %v2703_v49, %v91_v46  ;;  %2315 = vmatpush3.bf16.msra.mxu0 %v3037_v6  ;;  %v254_v46 = vand.u32 4294901760, %v3048_v42  ;;  %v3096_v19 = vsub.f32 %v2949_v24, %v158_v29  ;;  %v3108_v23 = vsub.f32 %v2962_v30, %v161_v33 }
  0x5b   :  { %v2707_v53 = vpop.eup %2706  ;;  %v95_v54 = vmul.f32 0.6931472, %v2705_v51  ;;  %v102_v55 = vsub.f32 2.0, %v100_v50  ;;  %v261_v47 = vand.u32 4294901760, %v3053_v43  ;;  %v268_v51 = vand.u32 4294901760, %v3070_v14 }
  0x5c   :  { %v103_v56 = vsub.f32 2.0, %v101_v52  ;;  %v97_v58 = vmul.f32 0.6931472, %v2707_v53  ;;  %v255_v9 = vsub.f32 %v3048_v42, %v254_v46  ;;  %v275_v52 = vand.u32 4294901760, %v3075_v15 }
  0x5d   :  { %v104_v57 = vmul.f32 %v2701_v48, %v102_v55  ;;  %v3059_v48 = vpack.c.bf16 %v249_v45, %v242_v44  ;;  %v262_v10 = vsub.f32 %v3053_v43, %v261_v47  ;;  %v269_v11 = vsub.f32 %v3070_v14, %v268_v51 }
  0x5e   :  { %v105_v59 = vmul.f32 %v2703_v49, %v103_v56  ;;  %v256_v49 = vand.u32 4294901760, %v255_v9  ;;  %v276_v18 = vsub.f32 %v3075_v15, %v275_v52  ;;  %v282_v56 = vand.u32 4294901760, %v3091_v16 }
  0x5f   :  { %v106_v60 = vmul.f32 %v104_v57, %v95_v54  ;;  %2317 = vmatprep.subr.bf16.mxu0 %v3059_v48  ;;  %v263_v50 = vand.u32 4294901760, %v262_v10  ;;  %v270_v54 = vand.u32 4294901760, %v269_v11  ;;  %v289_v57 = vand.u32 4294901760, %v3096_v19 }
  0x60   :  { %v107_v4 = vmul.f32 %v105_v59, %v97_v58  ;;  %v277_v55 = vand.u32 4294901760, %v276_v18  ;;  %v283_v59 = vsub.f32 %v3091_v16, %v282_v56  ;;  %v3113_v24 = vsub.f32 %v2964_v31, %v164_v34 }
  0x61   :  { %110 = vperm.xlu0 %2695, %v106_v60   ;;  %v3080_v53 = vpack.c.bf16 %v263_v50, %v256_v49  ;;  %v290_v28 = vsub.f32 %v3096_v19, %v289_v57  ;;  %v296_v60 = vand.u32 4294901760, %v3108_v23  ;;  %v3129_v31 = vsub.f32 %v2987_v61, %v167_v63 }
  0x62   :  { %v3100_v58 = vpack.c.bf16 %v277_v55, %v270_v54  ;;  %v284_v29 = vand.u32 4294901760, %v283_v59  ;;  %v3134_v34 = vsub.f32 %v2989_v62, %v170_v0  ;;  %v3147_v62 = vsub.f32 %v2999_v12, %v173_v20 }
  0x63   :  { %v291_v7 = vand.u32 4294901760, %v290_v28  ;;  %v297_v30 = vsub.f32 %v3108_v23, %v296_v60  ;;  %v3688_v9 = vand.u32 4294901760, %v3129_v31  ;;  %v3152_v63 = vsub.f32 %v3001_v13, %v176_v21 }
  0x64   :  { %v3687_v10 = vand.u32 4294901760, %v3134_v34  ;;  %v3686_v18 = vand.u32 4294901760, %v3147_v62  ;;  %v3162_v12 = vsub.f32 %v3023_v37, %v179_v39  ;;  %v3167_v13 = vsub.f32 %v3025_v38, %v182_v40 }
  0x65   :  { %115 = vperm.xlu0 %2695, %v107_v4   ;;  %v303_v4 = vand.u32 4294901760, %v3113_v24  ;;  %v2328_v8 = vpack.c.bf16 %v291_v7, %v284_v29  ;;  %v298_v44 = vand.u32 4294901760, %v297_v30  ;;  %v311_v50 = vsub.f32 %v3129_v31, %v3688_v9 }
  0x66   :  { %v318_v61 = vsub.f32 %v3134_v34, %v3687_v10  ;;  %v3685_v54 = vand.u32 4294901760, %v3152_v63  ;;  %v325_v59 = vsub.f32 %v3147_v62, %v3686_v18  ;;  %v3684_v28 = vand.u32 4294901760, %v3162_v12 }
  0x67   :  { %v304_v33 = vsub.f32 %v3113_v24, %v303_v4  ;;  %v312_v0 = vand.u32 4294901760, %v311_v50  ;;  %v3683_v29 = vand.u32 4294901760, %v3167_v13  ;;  %v2356_v50 = vpack.c.bf16 %v3075_v15, %v3070_v14 }
  0x68   :  { %v319_v11 = vand.u32 4294901760, %v318_v61  ;;  %v332_v20 = vsub.f32 %v3152_v63, %v3685_v54  ;;  %v326_v21 = vand.u32 4294901760, %v325_v59  ;;  %v339_v37 = vsub.f32 %v3162_v12, %v3684_v28 }
  0x69   :  { %v305_v45 = vand.u32 4294901760, %v304_v33  ;;  %v346_v39 = vsub.f32 %v3167_v13, %v3683_v29  ;;  %v2360_v61 = vpack.c.bf16 %v3096_v19, %v3091_v16  ;;  %v2372_v59 = vpack.c.bf16 %v3152_v63, %v3147_v62 }
  0x6a   :  { %v2336_v55 = vpack.c.bf16 %v319_v11, %v312_v0  ;;  %v333_v7 = vand.u32 4294901760, %v332_v20  ;;  %v340_v40 = vand.u32 4294901760, %v339_v37  ;;  %v2364_v0 = vpack.c.bf16 %v3113_v24, %v3108_v23 }
  0x6b   :  { %v2332_v49 = vpack.c.bf16 %v305_v45, %v298_v44  ;;  %v347_v30 = vand.u32 4294901760, %v346_v39  ;;  %v2348_v44 = vpack.c.bf16 %v3021_v36, %v3016_v26  ;;  %v2352_v45 = vpack.c.bf16 %v3053_v43, %v3048_v42 }
  0x6c   :  { %v2340_v38 = vpack.c.bf16 %v333_v7, %v326_v21  ;;  %v2368_v11 = vpack.c.bf16 %v3134_v34, %v3129_v31  ;;  %v2376_v20 = vpack.c.bf16 %v3167_v13, %v3162_v12  ;;  %v2420_v26 = vpack.c.bf16 %v275_v52, %v268_v51 }
  0x6d   :  { %v2344_v33 = vpack.c.bf16 %v347_v30, %v340_v40  ;;  %v2424_v36 = vpack.c.bf16 %v289_v57, %v282_v56  ;;  %v3709_v42 = vand.u32 4294901760, %v3134_v34  ;;  %v3712_v15 = vand.u32 4294901760, %v3162_v12 }
  0x6e   :  { %v3713_v51 = vand.u32 4294901760, %v3167_v13 }
  0x70   :  { %v2440_v52 = vpack.c.bf16 %v3713_v51, %v3712_v15 }
  0xe0   :  { %v111_v21 = vpop.permute.xlu0 %110 }
  0xe1   :  { %v118_v7 = vmul.f32 %v111_v21, %v2911_v1 }
  0xe3   :  { %v3197_v37 = vand.u32 4294901760, %v118_v7 }
  0xe4   :  { %v116_v39 = vpop.permute.xlu0 %115 }
  0xe5   :  { %v218_v40 = vsub.f32 %v118_v7, %v3197_v37  ;;  %v119_v30 = vmul.f32 %v116_v39, %v2913_v2  ;;  %v2412_v2 = vpack.c.bf16 %v247_v3, %v240_v41  ;;  %v2428_v41 = vpack.c.bf16 %v303_v4, %v296_v60 }
  0xe6   :  { %v3708_v3 = vand.u32 4294901760, %v3129_v31 }
  0xe7   :  { %v3201_v29 = vand.u32 4294901760, %v119_v30  ;;  %v219_v28 = vand.u32 4294901760, %v218_v40 }
  0xe8   :  { %v2432_v43 = vpack.c.bf16 %v3709_v42, %v3708_v3 }
  0xe9   :  { %v3204_v54 = vsub.f32 %v119_v30, %v3201_v29  ;;  %v220_v18 = vsub.f32 %v218_v40, %v219_v28  ;;  %v3310_v30 = vld [vmem:[#allocation7 + $0x38] sm:$0xff] }
  0xeb   :  { %v221_v10 = vand.u32 4294901760, %v220_v18  ;;  %v229_v9 = vand.u32 4294901760, %v3204_v54 }
  0xed   :  { %1896 = vmatprep.mubr.f32.mxu0 %v221_v10  ;;  %v230_v1 = vsub.f32 %v3204_v54, %v229_v9 }
  0xef   :  { %v231_v21 = vand.u32 4294901760, %v230_v1 }
  0xf1   :  { %1897 = vmatmul.mubr.f32.vlgmr.msra.gmra.mrb[0].mxu0 %v231_v21 }
  0xf2   :  { %2319 = vmatpush3.bf16.msra.mxu0 %v3059_v48  ;;  %1931 = vmatprep.mubr.f32.mxu0 %v3197_v37  ;;  %v2416_v48 = vpack.c.bf16 %v261_v47, %v254_v46  ;;  %v3710_v46 = vand.u32 4294901760, %v3147_v62  ;;  %v3711_v47 = vand.u32 4294901760, %v3152_v63 }
  0xf3   :  { %2321 = vmatprep.subr.bf16.mxu0 %v3080_v53 }
  0xf4   :  { %v2436_v14 = vpack.c.bf16 %v3711_v47, %v3710_v46  ;;  %v3330_v46 = vld [vmem:[#allocation7 + $0x50] sm:$0xff]  ;;  %v3332_v47 = vld [vmem:[#allocation7 + $0x58] sm:$0xff] }
  0xf5   :  { %v971_v15 = vand.u32 4294901760, %v3330_v46  ;;  %v974_v51 = vand.u32 4294901760, %v3332_v47 }
  0xf6   :  { %2323 = vmatpush3.bf16.msra.mxu0 %v3080_v53 }
  0xf7   :  { %2325 = vmatprep.subr.bf16.mxu0 %v3100_v58 }
  0xfa   :  { %2327 = vmatpush3.bf16.msra.mxu0 %v3100_v58 }
  0xfb   :  { %2329 = vmatprep.subr.bf16.mxu0 %v2328_v8 }
  0xfe   :  { %2331 = vmatpush3.bf16.msra.mxu0 %v2328_v8 }
  0xff   :  { %2333 = vmatprep.subr.bf16.mxu0 %v2332_v49 }
 0x102   :  { %2335 = vmatpush3.bf16.msra.mxu0 %v2332_v49  ;;  %v1647_v49 = vld [vmem:[%s3680_s3] ss:$0 sm:$0xff] }
 0x103   :  { %2337 = vmatprep.subr.bf16.mxu0 %v2336_v55 }
 0x106   :  { %2339 = vmatpush3.bf16.msra.mxu0 %v2336_v55 }
 0x107   :  { %2341 = vmatprep.subr.bf16.mxu0 %v2340_v38 }
 0x10a   :  { %2343 = vmatpush3.bf16.msra.mxu0 %v2340_v38 }
 0x10b   :  { %2345 = vmatprep.subr.bf16.mxu0 %v2344_v33 }
 0x10e   :  { %2347 = vmatpush3.bf16.msra.mxu0 %v2344_v33  ;;  %v924_v33 = vld [vmem:[#allocation7] sm:$0xff] }
 0x10f   :  { %2349 = vmatprep.subr.bf16.mxu0 %v2348_v44 }
 0x111   :  { %1932 = vmatmul.mubr.f32.vlgmr.msra.gmra.mrb[0].mxu0 %v3201_v29 }
 0x112   :  { %2351 = vmatpush3.bf16.msra.mxu0 %v2348_v44  ;;  %1966 = vmatprep.mubr.f32.mxu0 %v218_v40  ;;  %v925_v44 = vld [vmem:[#allocation7 + $0x8] sm:$0xff]  ;;  %v3308_v40 = vld [vmem:[#allocation7 + $0x30] sm:$0xff] }
 0x113   :  { %2353 = vmatprep.subr.bf16.mxu0 %v2352_v45 }
 0x116   :  { %2355 = vmatpush3.bf16.msra.mxu0 %v2352_v45  ;;  %v941_v45 = vand.u32 4294901760, %v924_v33 }
 0x117   :  { %2357 = vmatprep.subr.bf16.mxu0 %v2356_v50 }
 0x11a   :  { %2359 = vmatpush3.bf16.msra.mxu0 %v2356_v50  ;;  %v944_v50 = vand.u32 4294901760, %v925_v44 }
 0x11b   :  { %2361 = vmatprep.subr.bf16.mxu0 %v2360_v61 }
 0x11e   :  { %2363 = vmatpush3.bf16.msra.mxu0 %v2360_v61  ;;  %v3302_v61 = vpack.c.bf16 %v944_v50, %v941_v45 }
 0x11f   :  { %2365 = vmatprep.subr.bf16.mxu0 %v2364_v0 }
 0x120   :  { %2477 = vmatprep.subr.bf16.mxu1 %v3302_v61 }
 0x121   :  { %2479 = vmatpush3.bf16.msra.mxu1 %v3302_v61 }
 0x122   :  { %2367 = vmatpush3.bf16.msra.mxu0 %v2364_v0  ;;  %v926_v0 = vld [vmem:[#allocation7 + $0x10] sm:$0xff] }
 0x123   :  { %2369 = vmatprep.subr.bf16.mxu0 %v2368_v11 }
 0x126   :  { %2371 = vmatpush3.bf16.msra.mxu0 %v2368_v11  ;;  %v927_v11 = vld [vmem:[#allocation7 + $0x18] sm:$0xff] }
 0x127   :  { %2373 = vmatprep.subr.bf16.mxu0 %v2372_v59  ;;  %v950_v7 = vand.u32 4294901760, %v927_v11 }
 0x12a   :  { %2375 = vmatpush3.bf16.msra.mxu0 %v2372_v59  ;;  %v3304_v59 = vld [vmem:[#allocation7 + $0x20] sm:$0xff] }
 0x12b   :  { %2377 = vmatprep.subr.bf16.mxu0 %v2376_v20  ;;  %v953_v39 = vand.u32 4294901760, %v3304_v59 }
 0x12e   :  { %2379 = vmatpush3.bf16.msra.mxu0 %v2376_v20  ;;  %v947_v20 = vand.u32 4294901760, %v926_v0 }
 0x12f   :  { %2381 = vmatprep.subr.bf16.mxu0 %v2937_v17 }
 0x130   :  { %v3313_v21 = vpack.c.bf16 %v950_v7, %v947_v20 }
 0x131   :  { %1967 = vmatmul.mubr.f32.vlgmr.msra.gmra.mrb[0].mxu0 %v3204_v54 }
 0x132   :  { %2383 = vmatpush3.bf16.msra.mxu0 %v2937_v17  ;;  %2001 = vmatprep.mubr.f32.mxu0 %v219_v28 }
 0x133   :  { %2385 = vmatprep.subr.bf16.mxu0 %v2945_v22  ;;  %2481 = vmatprep.subr.bf16.mxu1 %v3313_v21 }
 0x134   :  { %2483 = vmatpush3.bf16.msra.mxu1 %v3313_v21 }
 0x136   :  { %2387 = vmatpush3.bf16.msra.mxu0 %v2945_v22 }
 0x137   :  { %2389 = vmatprep.subr.bf16.mxu0 %v2958_v27 }
 0x13a   :  { %2391 = vmatpush3.bf16.msra.mxu0 %v2958_v27 }
 0x13b   :  { %2393 = vmatprep.subr.bf16.mxu0 %v2972_v32 }
 0x13e   :  { %2395 = vmatpush3.bf16.msra.mxu0 %v2972_v32 }
 0x13f   :  { %2397 = vmatprep.subr.bf16.mxu0 %v2982_v35 }
 0x142   :  { %2399 = vmatpush3.bf16.msra.mxu0 %v2982_v35 }
 0x143   :  { %2401 = vmatprep.subr.bf16.mxu0 %v2997_v5 }
 0x146   :  { %2403 = vmatpush3.bf16.msra.mxu0 %v2997_v5 }
 0x147   :  { %2405 = vmatprep.subr.bf16.mxu0 %v3011_v25 }
 0x14a   :  { %2407 = vmatpush3.bf16.msra.mxu0 %v3011_v25 }
 0x14b   :  { %2409 = vmatprep.subr.bf16.mxu0 %v3037_v6 }
 0x14e   :  { %2411 = vmatpush3.bf16.msra.mxu0 %v3037_v6 }
 0x14f   :  { %2413 = vmatprep.subr.bf16.mxu0 %v2412_v2 }
 0x151   :  { %2002 = vmatmul.mubr.f32.vlgmr.msra.gmra.mrb[0].mxu0 %v229_v9  ;;  %v1646_v9 = vld [vmem:[%s3679_s2] ss:$0 sm:$0xff]  ;;  %s2828_s2 = smov [#allocation8]  }
 0x152   :  { %2415 = vmatpush3.bf16.msra.mxu0 %v2412_v2  ;;  %2036 = vmatprep.mubr.f32.mxu0 %v3197_v37  ;;  %v959_v2 = vand.u32 4294901760, %v3308_v40  ;;  %s1631_s3 = sshll.u32 %s2828_s2, 4  ;;  %s1632_s3 = int_to_ptr.vmem [resolvable:$true] %s1631_s3 }
 0x153   :  { %2417 = vmatprep.subr.bf16.mxu0 %v2416_v48  ;;  %s2794_s9 = scalar_lea.vmem %s1632_s3, 256  ;;  %p2799_p11 = scmp.lt.s32.totalorder %s1632_s3, %s1632_s3 }
 0x154   :  { %p2795_p10 = scmp.ne.s32.totalorder %s1632_s3, %s2794_s9  ;;  %p2800_p12 = scmp.lt.s32.totalorder %s2794_s9, %s2794_s9 }
 0x156   :  { %2419 = vmatpush3.bf16.msra.mxu0 %v2416_v48  ;;  %v962_v48 = vand.u32 4294901760, %v3310_v30  ;;  %p2801_p13 = por %p2800_p12, %p2799_p11 }
 0x157   :  { %2421 = vmatprep.subr.bf16.mxu0 %v2420_v26 }
 0x158   :  { %v3326_v3 = vpack.c.bf16 %v962_v48, %v959_v2  ;;  %p2802_p0 = pnand %p2801_p13, %p2795_p10 }
 0x15a   :  { %2423 = vmatpush3.bf16.msra.mxu0 %v2420_v26 }
 0x15b   :  { %2425 = vmatprep.subr.bf16.mxu0 %v2424_v36 }
 0x15e   :  { %2427 = vmatpush3.bf16.msra.mxu0 %v2424_v36  ;;  %v3319_v36 = vld [vmem:[#allocation7 + $0x40] sm:$0xff] }
 0x15f   :  { %2429 = vmatprep.subr.bf16.mxu0 %v2428_v41  ;;  %v965_v42 = vand.u32 4294901760, %v3319_v36 }
 0x162   :  { %2431 = vmatpush3.bf16.msra.mxu0 %v2428_v41  ;;  %v3321_v41 = vld [vmem:[#allocation7 + $0x48] sm:$0xff] }
 0x163   :  { %2433 = vmatprep.subr.bf16.mxu0 %v2432_v43 }
 0x166   :  { %2435 = vmatpush3.bf16.msra.mxu0 %v2432_v43  ;;  %v968_v43 = vand.u32 4294901760, %v3321_v41 }
 0x167   :  { %2437 = vmatprep.subr.bf16.mxu0 %v2436_v14 }
 0x16a   :  { %2439 = vmatpush3.bf16.msra.mxu0 %v2436_v14  ;;  %v3336_v14 = vpack.c.bf16 %v968_v43, %v965_v42 }
 0x16b   :  { %2441 = vmatprep.subr.bf16.mxu0 %v2440_v52 }
 0x16e   :  { %2443 = vmatpush3.bf16.msra.mxu0 %v2440_v52  ;;  %v3340_v52 = vld [vmem:[#allocation7 + $0x60] sm:$0xff] }
 0x16f   :  { %2445 = vmatprep.subr.bf16.mxu0 %v2937_v17 }
 0x171   :  { %2037 = vmatmul.mubr.f32.vlgmr.msra.gmra.mrb[0].mxu0 %v3201_v29 }
 0x172   :  { %2447 = vmatpush3.bf16.msra.mxu0 %v2937_v17  ;;  %2071 = vmatprep.mubr.f32.mxu0 %v3197_v37  ;;  %v929_v37 = vld [vmem:[#allocation7 + $0x28] sm:$0xff] }
 0x173   :  { %2449 = vmatprep.subr.bf16.mxu0 %v2945_v22  ;;  %v956_v1 = vand.u32 4294901760, %v929_v37 }
 0x175   :  { %v3317_v26 = vpack.c.bf16 %v956_v1, %v953_v39 }
 0x176   :  { %2451 = vmatpush3.bf16.msra.mxu0 %v2945_v22 }
 0x177   :  { %2453 = vmatprep.subr.bf16.mxu0 %v2958_v27  ;;  %2485 = vmatprep.subr.bf16.mxu1 %v3317_v26 }
 0x178   :  { %2487 = vmatpush3.bf16.msra.mxu1 %v3317_v26 }
 0x179   :  { %2489 = vmatprep.subr.bf16.mxu1 %v3326_v3 }
 0x17a   :  { %2455 = vmatpush3.bf16.msra.mxu0 %v2958_v27  ;;  %v64_v27 = vlaneseq }
 0x17b   :  { %2457 = vmatprep.subr.bf16.mxu0 %v2972_v32 }
 0x17c   :  { %2491 = vmatpush3.bf16.msra.mxu1 %v3326_v3 }
 0x17d   :  { %2493 = vmatprep.subr.bf16.mxu1 %v3336_v14 }
 0x17e   :  { %2459 = vmatpush3.bf16.msra.mxu0 %v2972_v32  ;;  %v3284_v32 = vand.u32 127, %v64_v27  ;;  %v977_v27 = vand.u32 4294901760, %v3340_v52 }
 0x17f   :  { %2461 = vmatprep.subr.bf16.mxu0 %v2982_v35 }
 0x180   :  { %vm67_vm4 = vcmp.ge.s32.totalorder %v3284_v32, 1  ;;  %vm68_vm5 = vcmp.lt.s32.totalorder %v3284_v32, 32  ;;  %2495 = vmatpush3.bf16.msra.mxu1 %v3336_v14  ;;  %vm66_vm11 = vcmp.eq.s32.totalorder %v3284_v32, 0 }
 0x181   :  { %vm69_vm6 = vmand %vm67_vm4, %vm68_vm5 }
 0x182   :  { %2463 = vmatpush3.bf16.msra.mxu0 %v2982_v35 }
 0x183   :  { %2465 = vmatprep.subr.bf16.mxu0 %v2997_v5 }
 0x186   :  { %2467 = vmatpush3.bf16.msra.mxu0 %v2997_v5 }
 0x187   :  { %2469 = vmatprep.subr.bf16.mxu0 %v3011_v25 }
 0x18a   :  { %2471 = vmatpush3.bf16.msra.mxu0 %v3011_v25 }
 0x18b   :  { %2473 = vmatprep.subr.bf16.mxu0 %v3037_v6 }
 0x18e   :  { %2475 = vmatpush3.bf16.msra.mxu0 %v3037_v6 }
 0x191   :  { %2072 = vmatmul.mubr.f32.vlgmr.msra.gmra.mrb[0].mxu0 %v3201_v29 }
 0x264   :  { %v2073_v17 = vpop.f32.mrb[0].mxu0 }
 0x265   :  { %v810_v22 = vpop.f32.mrb[1].mxu0 }
 0x266   :  { %822 = vadd.xlane.f32.xlu1 %v810_v22 }
 0x26a   :  { %824 = vadd.xlane.f32.xlu1 %v2073_v17 }
 0x2f3   :  { %v823_v35 = vpop.xlane.xlu1 %822 }
 0x2f4   :  { %v826_v5 = vmul.f32 0.032258064, %v823_v35 }
 0x2f6   :  { %v828_v25 = vsub.f32 %v810_v22, %v826_v5  ;;  %v3350_v22 = vpack.c.bf16 %v974_v51, %v971_v15  ;;  %v3354_v5 = vld [vmem:[#allocation7 + $0x70] sm:$0xff] }
 0x2f7   :  { %v825_v53 = vpop.xlane.xlu1 %824 }
 0x2f8   :  { %v827_v16 = vmul.f32 0.032258064, %v825_v53  ;;  %v832_v6 = vsel %vm69_vm6, %v828_v25, 0.0  ;;  %v3356_v25 = vld [vmem:[#allocation7 + $0x78] sm:$0xff]  ;;  %2497 = vmatprep.subr.bf16.mxu1 %v3350_v22 }
 0x2f9   :  { %v834_v19 = vmul.f32 %v832_v6, %v832_v6  ;;  %2499 = vmatpush3.bf16.msra.mxu1 %v3350_v22 }
 0x2fa   :  { %v829_v56 = vsub.f32 %v2073_v17, %v827_v16  ;;  %v3342_v17 = vld [vmem:[#allocation7 + $0x68] sm:$0xff]  ;;  %v983_v16 = vand.u32 4294901760, %v3354_v5 }
 0x2fb   :  { %836 = vadd.xlane.f32.xlu0 %v834_v19  ;;  %v980_v35 = vand.u32 4294901760, %v3342_v17 }
 0x2fc   :  { %v833_v57 = vsel %vm69_vm6, %v829_v56, 0.0  ;;  %v3376_v56 = vsub.f32 %v924_v33, %v941_v45  ;;  %v3419_v45 = vsub.f32 %v3308_v40, %v959_v2  ;;  %v3436_v40 = vsub.f32 %v3319_v36, %v965_v42 }
 0x2fd   :  { %v835_v58 = vmul.f32 %v833_v57, %v833_v57  ;;  %v3364_v53 = vpack.c.bf16 %v980_v35, %v977_v27  ;;  %v3461_v42 = vsub.f32 %v3332_v47, %v974_v51  ;;  %v3478_v47 = vsub.f32 %v3342_v17, %v980_v35 }
 0x2fe   :  { %v3494_v17 = vsub.f32 %v3354_v5, %v983_v16 }
 0x2ff   :  { %838 = vadd.xlane.f32.xlu1 %v835_v58  ;;  %2501 = vmatprep.subr.bf16.mxu1 %v3364_v53  ;;  %v3704_v58 = vand.u32 4294901760, %v3376_v56  ;;  %3714 = vst [vmem:[#allocation12_spill] sm:$0xff] %v3478_v47 }
 0x300   :  { %2503 = vmatpush3.bf16.msra.mxu1 %v3364_v53  ;;  %3715 = vst [vmem:[#allocation13_spill] sm:$0xff] %v3494_v17 }
 0x388   :  { %v837_v23 = vpop.xlane.xlu0 %836 }
 0x389   :  { %v840_v24 = vmul.f32 0.032258064, %v837_v23 }
 0x38b   :  { %v842_v60 = vadd.f32 1e-05, %v840_v24  ;;  %v1045_v24 = vsub.f32 %v3376_v56, %v3704_v58 }
 0x38c   :  { %v839_v4 = vpop.xlane.xlu1 %838 }
 0x38d   :  { %2708 = vrsqrt.f32 %v842_v60  ;;  %v841_v31 = vmul.f32 0.032258064, %v839_v4  ;;  %v3390_v4 = vsub.f32 %v926_v0, %v947_v20 }
 0x38f   :  { %v843_v34 = vadd.f32 1e-05, %v841_v31  ;;  %v3392_v31 = vsub.f32 %v927_v11, %v950_v7 }
 0x391   :  { %2710 = vrsqrt.f32 %v843_v34  ;;  %v1046_v34 = vand.u32 4294901760, %v1045_v24  ;;  %v3696_v24 = vand.u32 4294901760, %v3436_v40 }
 0x397   :  { %v2709_v8 = vpop.eup %2708 }
 0x398   :  { %v846_v10 = vmul.f32 %v2709_v8, %v832_v6  ;;  %v986_v6 = vand.u32 4294901760, %v3356_v25 }
 0x39a   :  { %v854_v62 = vmul.f32 %v1646_v9, %v846_v10  ;;  %v3374_v19 = vpack.c.bf16 %v986_v6, %v983_v16  ;;  %v3701_v10 = vand.u32 4294901760, %v3392_v31  ;;  %v3499_v35 = vsub.f32 %v3356_v25, %v986_v6 }
 0x39b   :  { %v2711_v63 = vpop.eup %2710 }
 0x39c   :  { %v862_v18 = vadd.f32 %v1647_v49, %v854_v62  ;;  %v847_v54 = vmul.f32 %v2711_v63, %v833_v57  ;;  %v3378_v57 = vsub.f32 %v925_v44, %v944_v50  ;;  %2505 = vmatprep.subr.bf16.mxu1 %v3374_v19  ;;  %v1066_v63 = vsub.f32 %v3392_v31, %v3701_v10 }
 0x39d   :  { %2507 = vmatpush3.bf16.msra.mxu1 %v3374_v19  ;;  %v3422_v50 = vsub.f32 %v3310_v30, %v962_v48  ;;  %v3439_v30 = vsub.f32 %v3321_v41, %v968_v43  ;;  %v3456_v41 = vsub.f32 %v3330_v46, %v971_v15  ;;  %v3473_v46 = vsub.f32 %v3340_v52, %v977_v27 }
 0x39e   :  { %v3294_v55 = vmax.f32 %v862_v18, 0.0  ;;  %v855_v12 = vmul.f32 %v1646_v9, %v847_v54  ;;  %v3703_v23 = vand.u32 4294901760, %v3378_v57  ;;  %v3702_v9 = vand.u32 4294901760, %v3390_v4  ;;  %3716 = vst [vmem:[#allocation14_spill] sm:$0xff] %v3499_v35 }
 0x39f   :  { %v3406_v18 = vsub.f32 %v3304_v59, %v953_v39  ;;  %v3408_v54 = vsub.f32 %v929_v37, %v956_v1  ;;  %v3698_v59 = vand.u32 4294901760, %v3419_v45  ;;  %v3697_v20 = vand.u32 4294901760, %v3422_v50 }
 0x3a0   :  { %v866_v13 = vmul.f32 %v3294_v55, %v3294_v55  ;;  %v863_v28 = vadd.f32 %v1647_v49, %v855_v12  ;;  %v1052_v60 = vsub.f32 %v3378_v57, %v3703_v23  ;;  %v1059_v62 = vsub.f32 %v3390_v4, %v3702_v9 }
 0x3a1   :  { %v1087_v37 = vsub.f32 %v3419_v45, %v3698_v59  ;;  %v1094_v39 = vsub.f32 %v3422_v50, %v3697_v20 }
 0x3a2   :  { %868 = vadd.xlane.f32.xlu1 %v866_v13  ;;  %v3298_v29 = vmax.f32 %v863_v28, 0.0  ;;  %v1053_v8 = vand.u32 4294901760, %v1052_v60  ;;  %v1060_v12 = vand.u32 4294901760, %v1059_v62  ;;  %v1067_v13 = vand.u32 4294901760, %v1066_v63 }
 0x3a3   :  { %v3700_v28 = vand.u32 4294901760, %v3406_v18  ;;  %v1088_v2 = vand.u32 4294901760, %v1087_v37  ;;  %v1095_v48 = vand.u32 4294901760, %v1094_v39  ;;  %v3695_v60 = vand.u32 4294901760, %v3439_v30 }
 0x3a4   :  { %v867_v38 = vmul.f32 %v3298_v29, %v3298_v29  ;;  %v3397_v49 = vpack.c.bf16 %v1053_v8, %v1046_v34  ;;  %v3413_v33 = vpack.c.bf16 %v1067_v13, %v1060_v12  ;;  %v1101_v8 = vsub.f32 %v3436_v40, %v3696_v24 }
 0x3a5   :  { %v1073_v44 = vsub.f32 %v3406_v18, %v3700_v28  ;;  %v3445_v34 = vpack.c.bf16 %v1095_v48, %v1088_v2  ;;  %v1108_v36 = vsub.f32 %v3439_v30, %v3695_v60  ;;  %v3694_v63 = vand.u32 4294901760, %v3456_v41 }
 0x3a6   :  { %870 = vadd.xlane.f32.xlu1 %v867_v38  ;;  %2509 = vmatprep.subr.bf16.mxu1 %v3397_v49  ;;  %v3699_v38 = vand.u32 4294901760, %v3408_v54  ;;  %v1102_v43 = vand.u32 4294901760, %v1101_v8  ;;  %v3693_v12 = vand.u32 4294901760, %v3461_v42  ;;  %v3690_v48 = vand.u32 4294901760, %v3494_v17 }
 0x3a7   :  { %v1074_v11 = vand.u32 4294901760, %v1073_v44  ;;  %v1109_v62 = vand.u32 4294901760, %v1108_v36  ;;  %v1115_v44 = vsub.f32 %v3456_v41, %v3694_v63  ;;  %v3689_v8 = vand.u32 4294901760, %v3499_v35 }
 0x3a8   :  { %v1080_v0 = vsub.f32 %v3408_v54, %v3699_v38  ;;  %v1122_v15 = vsub.f32 %v3461_v42, %v3693_v12  ;;  %v1143_v5 = vsub.f32 %v3494_v17, %v3690_v48 }
 0x3a9   :  { %v3465_v13 = vpack.c.bf16 %v1109_v62, %v1102_v43  ;;  %v1116_v51 = vand.u32 4294901760, %v1115_v44  ;;  %v1150_v16 = vsub.f32 %v3499_v35, %v3689_v8  ;;  %v3517_v62 = vpack.c.bf16 %v3378_v57, %v3376_v56 }
 0x3aa   :  { %v1081_v7 = vand.u32 4294901760, %v1080_v0  ;;  %v3692_v0 = vand.u32 4294901760, %v3473_v46  ;;  %v1144_v25 = vand.u32 4294901760, %v1143_v5  ;;  %v3521_v44 = vpack.c.bf16 %v3392_v31, %v3390_v4 }
 0x3ab   :  { %v1151_v6 = vand.u32 4294901760, %v1150_v16 }
 0x3ac   :  { %v3441_v1 = vpack.c.bf16 %v1081_v7, %v1074_v11  ;;  %v3691_v11 = vand.u32 4294901760, %v3478_v47  ;;  %v1123_v7 = vand.u32 4294901760, %v1122_v15  ;;  %v1129_v52 = vsub.f32 %v3473_v46, %v3692_v0 }
 0x3ad   :  { %v3513_v43 = vpack.c.bf16 %v1151_v6, %v1144_v25  ;;  %v3525_v15 = vpack.c.bf16 %v3408_v54, %v3406_v18 }
 0x3ae   :  { %v1136_v27 = vsub.f32 %v3478_v47, %v3691_v11  ;;  %v3501_v37 = vpack.c.bf16 %v1123_v7, %v1116_v51  ;;  %v1130_v39 = vand.u32 4294901760, %v1129_v52  ;;  %v3529_v51 = vpack.c.bf16 %v3422_v50, %v3419_v45 }
 0x3af   :  { %v3533_v7 = vpack.c.bf16 %v3439_v30, %v3436_v40  ;;  %v3537_v52 = vpack.c.bf16 %v3461_v42, %v3456_v41 }
 0x3b0   :  { %v1137_v2 = vand.u32 4294901760, %v1136_v27  ;;  %v3541_v27 = vpack.c.bf16 %v3478_v47, %v3473_v46 }
 0x3b2   :  { %v3505_v36 = vpack.c.bf16 %v1137_v2, %v1130_v39  ;;  %v3545_v39 = vpack.c.bf16 %v3499_v35, %v3494_v17 }
 0x42f   :  { %v869_v2 = vpop.xlane.xlu1 %868 }
 0x430   :  { %v872_v5 = vmax.f32 %v869_v2, 1e-16 }
 0x432   :  { %2712 = vrsqrt.f32 %v872_v5  ;;  %vm876_vm7 = vcmp.eq.f32.partialorder %v872_v5, inf  ;;  %v879_v48 = vand.u32 2147483648, %v872_v5  ;;  %vm878_vm8 = vcmp.eq.f32.partialorder %v872_v5, 0.0 }
 0x433   :  { %v871_v16 = vpop.xlane.xlu1 %870 }
 0x434   :  { %v873_v25 = vmax.f32 %v871_v16, 1e-16 }
 0x436   :  { %2714 = vrsqrt.f32 %v873_v25  ;;  %vm883_vm9 = vcmp.eq.f32.partialorder %v873_v25, inf  ;;  %vm885_vm10 = vcmp.eq.f32.partialorder %v873_v25, 0.0  ;;  %v886_v24 = vand.u32 2147483648, %v873_v25 }
 0x43c   :  { %v2713_v6 = vpop.eup %2712 }
 0x43d   :  { %v875_v8 = vmul.f32 %v2713_v6, %v872_v5 }
 0x43f   :  { %v877_v11 = vsel %vm876_vm7, %v872_v5, %v875_v8 }
 0x440   :  { %v2715_v0 = vpop.eup %2714  ;;  %v880_v12 = vsel %vm878_vm8, %v879_v48, %v877_v11 }
 0x441   :  { %v888_v63 = vmax.f32 %v880_v12, 1e-08  ;;  %v882_v60 = vmul.f32 %v2715_v0, %v873_v25 }
 0x443   :  { %v884_v20 = vsel %vm883_vm9, %v873_v25, %v882_v60  ;;  %v890_v59 = vmul.f32 1.442695, %v888_v63  ;;  %v894_v2 = vsub.f32 0.0, %v888_v63  ;;  %2716 = vrcp.f32 %v888_v63 }
 0x444   :  { %v887_v38 = vsel %vm885_vm10, %v886_v24, %v884_v20 }
 0x445   :  { %v889_v16 = vmax.f32 %v887_v38, 1e-08  ;;  %v896_v28 = vmul.f32 1.442695, %v894_v2  ;;  %2718 = vpow2.f32 %v890_v59 }
 0x447   :  { %2720 = vrcp.f32 %v889_v16  ;;  %v892_v6 = vmul.f32 1.442695, %v889_v16  ;;  %v895_v10 = vsub.f32 0.0, %v889_v16 }
 0x448   :  { %2722 = vpow2.f32 %v896_v28 }
 0x449   :  { %v898_v8 = vmul.f32 1.442695, %v895_v10  ;;  %2724 = vpow2.f32 %v892_v6 }
 0x44b   :  { %2726 = vpow2.f32 %v898_v8 }
 0x44d   :  { %v2717_v12 = vpop.eup %2716 }
 0x44e   :  { %v910_v0 = vmul.f32 %v2717_v12, %v888_v63 }
 0x44f   :  { %v2719_v11 = vpop.eup %2718 }
 0x450   :  { %v912_v5 = vsub.f32 2.0, %v910_v0 }
 0x451   :  { %v2721_v48 = vpop.eup %2720 }
 0x452   :  { %v2723_v60 = vpop.eup %2722  ;;  %v911_v25 = vmul.f32 %v2721_v48, %v889_v16  ;;  %v914_v2 = vmul.f32 %v2717_v12, %v912_v5 }
 0x453   :  { %v904_v9 = vsub.f32 %v2719_v11, %v2723_v60  ;;  %v2725_v23 = vpop.eup %2724  ;;  %v900_v24 = vadd.f32 %v2723_v60, %v2719_v11 }
 0x454   :  { %v913_v20 = vsub.f32 2.0, %v911_v25 }
 0x455   :  { %v2727_v38 = vpop.eup %2726  ;;  %v906_v59 = vmul.f32 0.5, %v904_v9  ;;  %v902_v63 = vmul.f32 0.5, %v900_v24 }
 0x456   :  { %v905_v58 = vsub.f32 %v2725_v23, %v2727_v38  ;;  %v901_v10 = vadd.f32 %v2727_v38, %v2725_v23  ;;  %v915_v6 = vmul.f32 %v2721_v48, %v913_v20 }
 0x457   :  { %v916_v35 = vmul.f32 %v914_v2, %v906_v59 }
 0x458   :  { %v907_v28 = vmul.f32 0.5, %v905_v58  ;;  %v903_v47 = vmul.f32 0.5, %v901_v10 }
 0x459   :  { %v918_v8 = vmul.f32 %v916_v35, %v3294_v55 }
 0x45a   :  { %v917_v0 = vmul.f32 %v915_v6, %v907_v28 }
 0x45b   :  { %v922_v17 = vsel %vm66_vm11, %v902_v63, %v918_v8 }
 0x45c   :  { %v3549_v16 = vand.u32 4294901760, %v922_v17  ;;  %v919_v25 = vmul.f32 %v917_v0, %v3298_v29  ;;  %v3717_v29 = vand.u32 4294901760, %v3376_v56  ;;  %v3722_v56 = vand.u32 4294901760, %v3408_v54 }
 0x45d   :  { %v3728_v54 = vand.u32 4294901760, %v3461_v42 }
 0x45e   :  { %v1022_v9 = vsub.f32 %v922_v17, %v3549_v16  ;;  %v923_v12 = vsel %vm66_vm11, %v903_v47, %v919_v25  ;;  %v3721_v47 = vand.u32 4294901760, %v3406_v18  ;;  %v3727_v18 = vand.u32 4294901760, %v3456_v41 }
 0x45f   :  { %v3553_v11 = vand.u32 4294901760, %v923_v12 }
 0x460   :  { %v1023_v5 = vand.u32 4294901760, %v1022_v9  ;;  %v2612_v17 = vpack.c.bf16 %v3722_v56, %v3721_v47 }
 0x461   :  { %v3556_v32 = vsub.f32 %v923_v12, %v3553_v11 }
 0x462   :  { %v1024_v58 = vsub.f32 %v1022_v9, %v1023_v5 }
 0x463   :  { %v1033_v23 = vand.u32 4294901760, %v3556_v32 }
 0x464   :  { %v1025_v55 = vand.u32 4294901760, %v1024_v58 }
 0x465   :  { %v1034_v35 = vsub.f32 %v3556_v32, %v1033_v23 }
 0x466   :  { %2106 = vmatprep.mubr.f32.mxu1 %v1025_v55 }
 0x467   :  { %v1035_v48 = vand.u32 4294901760, %v1034_v35 }
 0x469   :  { %2107 = vmatmul.mubr.f32.vlgmr.msra.gmra.mrb[0].mxu1 %v1035_v48 }
 0x46a   :  { %2511 = vmatpush3.bf16.msra.mxu1 %v3397_v49  ;;  %2141 = vmatprep.mubr.f32.mxu1 %v3549_v16  ;;  %v3718_v49 = vand.u32 4294901760, %v3378_v57  ;;  %v3723_v57 = vand.u32 4294901760, %v3419_v45  ;;  %v3729_v45 = vand.u32 4294901760, %v3473_v46 }
 0x46b   :  { %2513 = vmatprep.subr.bf16.mxu1 %v3413_v33 }
 0x46e   :  { %2515 = vmatpush3.bf16.msra.mxu1 %v3413_v33  ;;  %v2604_v33 = vpack.c.bf16 %v3718_v49, %v3717_v29 }
 0x46f   :  { %2517 = vmatprep.subr.bf16.mxu1 %v3441_v1 }
 0x472   :  { %2519 = vmatpush3.bf16.msra.mxu1 %v3441_v1  ;;  %v3719_v1 = vand.u32 4294901760, %v3390_v4 }
 0x473   :  { %2521 = vmatprep.subr.bf16.mxu1 %v3445_v34 }
 0x476   :  { %2523 = vmatpush3.bf16.msra.mxu1 %v3445_v34  ;;  %v3720_v34 = vand.u32 4294901760, %v3392_v31  ;;  %v3725_v31 = vand.u32 4294901760, %v3436_v40  ;;  %v3732_v40 = vld [vmem:[#allocation13_spill] sm:$0xff] }
 0x477   :  { %2525 = vmatprep.subr.bf16.mxu1 %v3465_v13 }
 0x47a   :  { %2527 = vmatpush3.bf16.msra.mxu1 %v3465_v13  ;;  %v2608_v13 = vpack.c.bf16 %v3720_v34, %v3719_v1 }
 0x47b   :  { %2529 = vmatprep.subr.bf16.mxu1 %v3501_v37 }
 0x47e   :  { %2531 = vmatpush3.bf16.msra.mxu1 %v3501_v37  ;;  %v3724_v37 = vand.u32 4294901760, %v3422_v50  ;;  %v3730_v50 = vld [vmem:[#allocation12_spill] sm:$0xff] }
 0x47f   :  { %2533 = vmatprep.subr.bf16.mxu1 %v3505_v36 }
 0x480   :  { %v2616_v4 = vpack.c.bf16 %v3724_v37, %v3723_v57 }
 0x482   :  { %2535 = vmatpush3.bf16.msra.mxu1 %v3505_v36  ;;  %v3726_v36 = vand.u32 4294901760, %v3439_v30  ;;  %v3734_v30 = vld [vmem:[#allocation14_spill] sm:$0xff] }
 0x483   :  { %2537 = vmatprep.subr.bf16.mxu1 %v3513_v43 }
 0x486   :  { %2539 = vmatpush3.bf16.msra.mxu1 %v3513_v43  ;;  %v2620_v43 = vpack.c.bf16 %v3726_v36, %v3725_v31 }
 0x487   :  { %2541 = vmatprep.subr.bf16.mxu1 %v3517_v62 }
 0x489   :  { %2142 = vmatmul.mubr.f32.vlgmr.msra.gmra.mrb[0].mxu1 %v3553_v11 }
 0x48a   :  { %2543 = vmatpush3.bf16.msra.mxu1 %v3517_v62  ;;  %2176 = vmatprep.mubr.f32.mxu1 %v1022_v9  ;;  %v2624_v62 = vpack.c.bf16 %v3728_v54, %v3727_v18 }
 0x48b   :  { %2545 = vmatprep.subr.bf16.mxu1 %v3521_v44 }
 0x48e   :  { %2547 = vmatpush3.bf16.msra.mxu1 %v3521_v44  ;;  %v3731_v44 = vand.u32 4294901760, %v3730_v50 }
 0x48f   :  { %2549 = vmatprep.subr.bf16.mxu1 %v3525_v15 }
 0x492   :  { %2551 = vmatpush3.bf16.msra.mxu1 %v3525_v15  ;;  %v2628_v15 = vpack.c.bf16 %v3731_v44, %v3729_v45 }
 0x493   :  { %2553 = vmatprep.subr.bf16.mxu1 %v3529_v51 }
 0x496   :  { %2555 = vmatpush3.bf16.msra.mxu1 %v3529_v51  ;;  %v3733_v51 = vand.u32 4294901760, %v3732_v40 }
 0x497   :  { %2557 = vmatprep.subr.bf16.mxu1 %v3533_v7 }
 0x49a   :  { %2559 = vmatpush3.bf16.msra.mxu1 %v3533_v7  ;;  %v3735_v7 = vand.u32 4294901760, %v3734_v30 }
 0x49b   :  { %2561 = vmatprep.subr.bf16.mxu1 %v3537_v52 }
 0x49e   :  { %2563 = vmatpush3.bf16.msra.mxu1 %v3537_v52  ;;  %v2632_v52 = vpack.c.bf16 %v3735_v7, %v3733_v51 }
 0x49f   :  { %2565 = vmatprep.subr.bf16.mxu1 %v3541_v27 }
 0x4a2   :  { %2567 = vmatpush3.bf16.msra.mxu1 %v3541_v27 }
 0x4a3   :  { %2569 = vmatprep.subr.bf16.mxu1 %v3545_v39 }
 0x4a6   :  { %2571 = vmatpush3.bf16.msra.mxu1 %v3545_v39 }
 0x4a7   :  { %2573 = vmatprep.subr.bf16.mxu1 %v3302_v61 }
 0x4a9   :  { %2177 = vmatmul.mubr.f32.vlgmr.msra.gmra.mrb[0].mxu1 %v3556_v32 }
 0x4aa   :  { %2575 = vmatpush3.bf16.msra.mxu1 %v3302_v61  ;;  %2211 = vmatprep.mubr.f32.mxu1 %v1023_v5 }
 0x4ab   :  { %2577 = vmatprep.subr.bf16.mxu1 %v3313_v21 }
 0x4ae   :  { %2579 = vmatpush3.bf16.msra.mxu1 %v3313_v21 }
 0x4af   :  { %2581 = vmatprep.subr.bf16.mxu1 %v3317_v26 }
 0x4b2   :  { %2583 = vmatpush3.bf16.msra.mxu1 %v3317_v26 }
 0x4b3   :  { %2585 = vmatprep.subr.bf16.mxu1 %v3326_v3 }
 0x4b6   :  { %2587 = vmatpush3.bf16.msra.mxu1 %v3326_v3 }
 0x4b7   :  { %2589 = vmatprep.subr.bf16.mxu1 %v3336_v14 }
 0x4ba   :  { %2591 = vmatpush3.bf16.msra.mxu1 %v3336_v14 }
 0x4bb   :  { %2593 = vmatprep.subr.bf16.mxu1 %v3350_v22 }
 0x4be   :  { %2595 = vmatpush3.bf16.msra.mxu1 %v3350_v22 }
 0x4bf   :  { %2597 = vmatprep.subr.bf16.mxu1 %v3364_v53 }
 0x4c2   :  { %2599 = vmatpush3.bf16.msra.mxu1 %v3364_v53 }
 0x4c3   :  { %2601 = vmatprep.subr.bf16.mxu1 %v3374_v19 }
 0x4c6   :  { %2603 = vmatpush3.bf16.msra.mxu1 %v3374_v19 }
 0x4c7   :  { %2605 = vmatprep.subr.bf16.mxu1 %v2604_v33 }
 0x4c9   :  { %2212 = vmatmul.mubr.f32.vlgmr.msra.gmra.mrb[0].mxu1 %v1033_v23 }
 0x4ca   :  { %2607 = vmatpush3.bf16.msra.mxu1 %v2604_v33  ;;  %2246 = vmatprep.mubr.f32.mxu1 %v3549_v16 }
 0x4cb   :  { %2609 = vmatprep.subr.bf16.mxu1 %v2608_v13 }
 0x4ce   :  { %2611 = vmatpush3.bf16.msra.mxu1 %v2608_v13 }
 0x4cf   :  { %2613 = vmatprep.subr.bf16.mxu1 %v2612_v17 }
 0x4d2   :  { %2615 = vmatpush3.bf16.msra.mxu1 %v2612_v17 }
 0x4d3   :  { %2617 = vmatprep.subr.bf16.mxu1 %v2616_v4 }
 0x4d6   :  { %2619 = vmatpush3.bf16.msra.mxu1 %v2616_v4 }
 0x4d7   :  { %2621 = vmatprep.subr.bf16.mxu1 %v2620_v43 }
 0x4da   :  { %2623 = vmatpush3.bf16.msra.mxu1 %v2620_v43 }
 0x4db   :  { %2625 = vmatprep.subr.bf16.mxu1 %v2624_v62 }
 0x4de   :  { %2627 = vmatpush3.bf16.msra.mxu1 %v2624_v62 }
 0x4df   :  { %2629 = vmatprep.subr.bf16.mxu1 %v2628_v15 }
 0x4e2   :  { %2631 = vmatpush3.bf16.msra.mxu1 %v2628_v15 }
 0x4e3   :  { %2633 = vmatprep.subr.bf16.mxu1 %v2632_v52 }
 0x4e6   :  { %2635 = vmatpush3.bf16.msra.mxu1 %v2632_v52 }
 0x4e7   :  { %2637 = vmatprep.subr.bf16.mxu1 %v3302_v61 }
 0x4e9   :  { %2247 = vmatmul.mubr.f32.vlgmr.msra.gmra.mrb[0].mxu1 %v3553_v11 }
 0x4ea   :  { %2639 = vmatpush3.bf16.msra.mxu1 %v3302_v61  ;;  %2281 = vmatprep.mubr.f32.mxu1 %v3549_v16 }
 0x4eb   :  { %2641 = vmatprep.subr.bf16.mxu1 %v3313_v21 }
 0x4ee   :  { %2643 = vmatpush3.bf16.msra.mxu1 %v3313_v21 }
 0x4ef   :  { %2645 = vmatprep.subr.bf16.mxu1 %v3317_v26 }
 0x4f2   :  { %2647 = vmatpush3.bf16.msra.mxu1 %v3317_v26 }
 0x4f3   :  { %2649 = vmatprep.subr.bf16.mxu1 %v3326_v3 }
 0x4f6   :  { %2651 = vmatpush3.bf16.msra.mxu1 %v3326_v3 }
 0x4f7   :  { %2653 = vmatprep.subr.bf16.mxu1 %v3336_v14 }
 0x4fa   :  { %2655 = vmatpush3.bf16.msra.mxu1 %v3336_v14 }
 0x4fb   :  { %2657 = vmatprep.subr.bf16.mxu1 %v3350_v22 }
 0x4fe   :  { %2659 = vmatpush3.bf16.msra.mxu1 %v3350_v22 }
 0x4ff   :  { %2661 = vmatprep.subr.bf16.mxu1 %v3364_v53 }
 0x502   :  { %2663 = vmatpush3.bf16.msra.mxu1 %v3364_v53 }
 0x503   :  { %2665 = vmatprep.subr.bf16.mxu1 %v3374_v19 }
 0x506   :  { %2667 = vmatpush3.bf16.msra.mxu1 %v3374_v19 }
 0x509   :  { %2282 = vmatmul.mubr.f32.vlgmr.msra.gmra.mrb[0].mxu1 %v3553_v11 }
 0x5dc   :  { %v2283_v61 = vpop.f32.mrb[0].mxu1 }
 0x5dd   :  { %1625 = vst [vmem:[#allocation8 + $0x8] sm:$0xff] %v2283_v61  ;;  %v1614_v21 = vpop.f32.mrb[1].mxu1 }
 0x5de   :  { %1624 = vst [vmem:[#allocation8] sm:$0xff] %v1614_v21 }
 0x5df   :  { %2805 = shalt.err (!%p2802_p0)
}
 0x5e0   :  { %s2806_s12 = scalar_lea.hbm %s3682_s5, 256 }
 0x5e1   :  { %p2807_p1 = scmp.ne.s32.totalorder %s3682_s5, %s2806_s12  ;;  %p2810_p2 = scmp.lt.u32.totalorder %s2806_s12, %s3682_s5 }
 0x5e3   :  { %p2812_p3 = pnand %p2810_p2, %p2807_p1 }
 0x5e5   :  { %2815 = shalt.err (!%p2812_p3)
}
 0x5e6   :  { %1637 = dma.vmem_to_hbm [thread:$0]  %s1632_s3, 256, %s3682_s5, [#allocation4], %s2824_s30, %s2824_s30, %s2825_s6  }
 0x5e7   :  { %2820 = dma.done.wait [#allocation4], 256  }
 0x5e8   :  { %2821 = vsyncadd [#allocation4], 4294967040 }
 0x5e9   :  { %1641 = vsyncpa [#allocation3], 1 }
 0x5ea   :  { %1642 = vsyncpa [#allocation6], 1 }
 0x5eb   :  { %1643 = vsyncpa [#allocation4], 1 }

</bundles_post_ra>
